<compile_context>
chip_gen: v7x
topology: tpu7x:2x2x1
jax: 0.10.0
libtpu: 0.0.40
codegen_flags: <defaults>
</compile_context>

<pallas_src>
import numpy as np
import jax
import jax.numpy as jnp
from jax.experimental import pallas as pl
from jax.experimental.pallas import tpu as pltpu


def _fourier_kernel(x_ref, bt_ref, out_ref):
    # x_ref:  (tm, in_features)        VMEM tile of input points
    # bt_ref: (in_features, num_freq)  B.T in "turns" (no 2*pi folded in)
    # out_ref:(tm, 2*num_freq)         [sin | cos]
    x = x_ref[...].astype(jnp.float32)
    bt = bt_ref[...].astype(jnp.float32)
    in_features = bt.shape[0]
    num_freq = bt.shape[1]

    if in_features <= 8:
        # K is tiny: unrolled VPU broadcast FMAs; avoids a >95%-zero MXU matmul.
        t = x[:, 0:1] * bt[0:1, :]
        for k in range(1, in_features):
            t = t + x[:, k:k + 1] * bt[k:k + 1, :]
    else:
        # Fallback for larger feature counts where the MXU is actually useful.
        t = jnp.dot(x, bt, preferred_element_type=jnp.float32)

    # ---- Fused sincos of (2*pi*t) with a single shared range reduction ----
    # Quarter-turn index and residual angle theta in [-pi/4, pi/4].
    q = jnp.round(4.0 * t)
    theta = (2.0 * np.pi) * (t - 0.25 * q)
    th2 = theta * theta

    # sin/cos polynomials on [-pi/4, pi/4] (abs err < ~4e-7).
    s = theta * (1.0 + th2 * (-1.0 / 6.0
                 + th2 * (1.0 / 120.0
                 + th2 * (-1.0 / 5040.0))))
    c = 1.0 + th2 * (-0.5
          + th2 * (1.0 / 24.0
          + th2 * (-1.0 / 720.0
          + th2 * (1.0 / 40320.0))))

    # Quadrant fix-up: full angle = q*(pi/2) + theta, k = q mod 4.
    k4 = jnp.bitwise_and(q.astype(jnp.int32), 3)
    swap = jnp.bitwise_and(k4, 1) == 1          # odd quadrant -> swap sin/cos
    sin_v = jnp.where(swap, c, s)
    cos_v = jnp.where(swap, s, c)
    sin_v = jnp.where(k4 >= 2, -sin_v, sin_v)                   # k in {2,3}
    cos_v = jnp.where((k4 == 1) | (k4 == 2), -cos_v, cos_v)     # k in {1,2}

    # num_freq is a multiple of 128 -> both stores are lane-aligned, unmasked.
    out_ref[:, :num_freq] = sin_v.astype(out_ref.dtype)
    out_ref[:, num_freq:] = cos_v.astype(out_ref.dtype)


def _round_up(a, b):
    return ((a + b - 1) // b) * b


def _device_kind():
    try:
        return jax.devices()[0].device_kind.lower()
    except Exception:
        return ""


def fourier_feat_mapping(x, B, *, tm=None, out_dtype=None):
    """x: (..., in_features); B: (num_freq, in_features) -> (..., 2*num_freq)."""
    in_features = x.shape[-1]
    num_freq = B.shape[0]
    lead_shape = x.shape[:-1]
    out_dtype = x.dtype if out_dtype is None else out_dtype

    x2d = x.reshape(-1, in_features)
    N = x2d.shape[0]

    kind = _device_kind()
    if tm is None:
        # v5e is the most HBM-bound generation: bigger lane-dense output tiles
        # (4 MiB, ~10 MiB total double-buffered incl. lane-padded x) still fit
        # its 16 MiB default scoped VMEM. v6e/v7x stay at 1024.
        tm = 2048 if "v5" in kind else 1024
    if "v7" in kind:
        # Only v7x has 2 TensorCores: keep >=2 (even) grid steps when N permits
        # so the "parallel" axis shards across both TCs.
        tm = min(tm, max(8, _round_up(pl.cdiv(N, 2), 8)))
    # Never make the tile larger than the (8-aligned) problem: avoids wasted
    # VALU work on masked rows for small N.
    tm = min(tm, max(8, _round_up(N, 8)))

    # Zero-pad x (cheap: N*in_features*4 bytes) so the last block never reads
    # unspecified values; the OUTPUT is NOT padded -- Pallas masks the partial
    # last output block, so no extra slice/copy of the (N, 2F) result.
    n_pad = _round_up(N, tm)
    if n_pad != N:
        x2d = jnp.pad(x2d, ((0, n_pad - N), (0, 0)))

    # Keep B in "turns": 2*pi is applied inside the kernel AFTER mod-1/4
    # range reduction (more accurate than pre-scaling, and lets sin/cos share
    # one reduction).
    Bt = jnp.transpose(B).astype(jnp.float32)

    out_elems = N * 2 * num_freq
    cost = pl.CostEstimate(
        flops=int(N * num_freq * (2 * in_features + 30)),
        transcendentals=0,  # sincos is evaluated as VALU polynomials
        bytes_accessed=int(x2d.size * 4 + Bt.size * 4
                           + out_elems * jnp.dtype(out_dtype).itemsize),
    )

    grid = (n_pad // tm,)
    out2d = pl.pallas_call(
        _fourier_kernel,
        out_shape=jax.ShapeDtypeStruct((N, 2 * num_freq), out_dtype),
        grid_spec=pltpu.PrefetchScalarGridSpec(
            num_scalar_prefetch=0,
            grid=grid,
            in_specs=[
                pl.BlockSpec((tm, in_features), lambda i: (i, 0)),
                pl.BlockSpec((in_features, num_freq), lambda i: (0, 0)),
            ],
            out_specs=pl.BlockSpec((tm, 2 * num_freq), lambda i: (i, 0)),
        ),
        compiler_params=pltpu.CompilerParams(
            dimension_semantics=("parallel",),
        ),
        cost_estimate=cost,
    )(x2d, Bt)

    return out2d.reshape(*lead_shape, 2 * num_freq)


if __name__ == "__main__":
    key = jax.random.PRNGKey(0)
    k_b, k_x = jax.random.split(key)

    in_features = 3
    num_frequencies = 256
    scale = 10.0

    # Deterministic "buffer" B ~ N(0, scale), shape (num_frequencies, in_features)
    B = scale * jax.random.normal(k_b, (num_frequencies, in_features), dtype=jnp.float32)

    # Example input: batch=2, 64 points each, 3 coordinates
    x = jax.random.normal(k_x, (2, 64, in_features), dtype=jnp.float32)

    out = fourier_feat_mapping(x, B)
    out = jax.block_until_ready(out)

    # Sanity check against plain-JAX reference (spec order: matmul then 2*pi).
    proj_ref = 2.0 * np.pi * jnp.matmul(x, B.T)
    ref = jnp.concatenate([jnp.sin(proj_ref), jnp.cos(proj_ref)], axis=-1)
    assert out.shape == ref.shape == (2, 64, 2 * num_frequencies)
    # Arguments reach O(100); f32 trig of large args tolerates ~1e-3 abs.
    np.testing.assert_allclose(np.asarray(out), np.asarray(ref), atol=1e-3, rtol=1e-3)

    print("KERNEL_OK")
</pallas_src>

<mosaic_0001>
module attributes {stable_mosaic.version = 11 : i64} {
  func.func @_fourier_kernel(%arg0: i32, %arg1: memref<128x3xf32, #tpu.memory_space<vmem>>, %arg2: memref<3x256xf32, #tpu.memory_space<vmem>>, %arg3: memref<128x512xf32, #tpu.memory_space<vmem>>) attributes {dimension_semantics = [#tpu.dimension_semantics<parallel>], iteration_bounds = array<i64: 1>, scalar_prefetch = 0 : i64, scratch_operands = 0 : i64, tpu.core_type = #tpu.core_type<tc>, window_params = [{transform_indices = @transform_0, window_bounds = array<i64: 128, 3>}, {pipeline_mode = #tpu.pipeline_mode<synchronous>, transform_indices = @transform_1, window_bounds = array<i64: 3, 256>}, {transform_indices = @transform_2, window_bounds = array<i64: 128, 512>}]} {
    %c0 = arith.constant 0 : index
    %c0_0 = arith.constant 0 : index
    %0 = vector.load %arg1[%c0, %c0_0] : memref<128x3xf32, #tpu.memory_space<vmem>>, vector<128x3xf32>
    %c0_1 = arith.constant 0 : index
    %c0_2 = arith.constant 0 : index
    %1 = vector.load %arg2[%c0_1, %c0_2] : memref<3x256xf32, #tpu.memory_space<vmem>>, vector<3x256xf32>
    %2 = vector.extract_strided_slice %0 {offsets = [0, 0], sizes = [128, 1], strides = [1, 1]} : vector<128x3xf32> to vector<128x1xf32>
    %3 = vector.extract_strided_slice %1 {offsets = [0, 0], sizes = [1, 256], strides = [1, 1]} : vector<3x256xf32> to vector<1x256xf32>
    %4 = vector.broadcast %2 : vector<128x1xf32> to vector<128x256xf32>
    %5 = vector.broadcast %3 : vector<1x256xf32> to vector<128x256xf32>
    %6 = arith.mulf %4, %5 : vector<128x256xf32>
    %7 = vector.extract_strided_slice %0 {offsets = [0, 1], sizes = [128, 1], strides = [1, 1]} : vector<128x3xf32> to vector<128x1xf32>
    %8 = vector.extract_strided_slice %1 {offsets = [1, 0], sizes = [1, 256], strides = [1, 1]} : vector<3x256xf32> to vector<1x256xf32>
    %9 = vector.broadcast %7 : vector<128x1xf32> to vector<128x256xf32>
    %10 = vector.broadcast %8 : vector<1x256xf32> to vector<128x256xf32>
    %11 = arith.mulf %9, %10 : vector<128x256xf32>
    %12 = arith.addf %6, %11 : vector<128x256xf32>
    %13 = vector.extract_strided_slice %0 {offsets = [0, 2], sizes = [128, 1], strides = [1, 1]} : vector<128x3xf32> to vector<128x1xf32>
    %14 = vector.extract_strided_slice %1 {offsets = [2, 0], sizes = [1, 256], strides = [1, 1]} : vector<3x256xf32> to vector<1x256xf32>
    %15 = vector.broadcast %13 : vector<128x1xf32> to vector<128x256xf32>
    %16 = vector.broadcast %14 : vector<1x256xf32> to vector<128x256xf32>
    %17 = arith.mulf %15, %16 : vector<128x256xf32>
    %18 = arith.addf %12, %17 : vector<128x256xf32>
    %cst = arith.constant 4.000000e+00 : f32
    %19 = vector.broadcast %cst : f32 to vector<128x256xf32>
    %20 = arith.mulf %19, %18 : vector<128x256xf32>
    %21 = math.roundeven %20 : vector<128x256xf32>
    %cst_3 = arith.constant 2.500000e-01 : f32
    %22 = vector.broadcast %cst_3 : f32 to vector<128x256xf32>
    %23 = arith.mulf %22, %21 : vector<128x256xf32>
    %24 = arith.subf %18, %23 : vector<128x256xf32>
    %cst_4 = arith.constant 6.28318548 : f32
    %25 = vector.broadcast %cst_4 : f32 to vector<128x256xf32>
    %26 = arith.mulf %25, %24 : vector<128x256xf32>
    %27 = arith.mulf %26, %26 : vector<128x256xf32>
    %cst_5 = arith.constant -1.98412701E-4 : f32
    %28 = vector.broadcast %cst_5 : f32 to vector<128x256xf32>
    %29 = arith.mulf %27, %28 : vector<128x256xf32>
    %cst_6 = arith.constant 0.00833333377 : f32
    %30 = vector.broadcast %cst_6 : f32 to vector<128x256xf32>
    %31 = arith.addf %30, %29 : vector<128x256xf32>
    %32 = arith.mulf %27, %31 : vector<128x256xf32>
    %cst_7 = arith.constant -0.166666672 : f32
    %33 = vector.broadcast %cst_7 : f32 to vector<128x256xf32>
    %34 = arith.addf %33, %32 : vector<128x256xf32>
    %35 = arith.mulf %27, %34 : vector<128x256xf32>
    %cst_8 = arith.constant 1.000000e+00 : f32
    %36 = vector.broadcast %cst_8 : f32 to vector<128x256xf32>
    %37 = arith.addf %36, %35 : vector<128x256xf32>
    %38 = arith.mulf %26, %37 : vector<128x256xf32>
    %cst_9 = arith.constant 2.48015876E-5 : f32
    %39 = vector.broadcast %cst_9 : f32 to vector<128x256xf32>
    %40 = arith.mulf %27, %39 : vector<128x256xf32>
    %cst_10 = arith.constant -0.00138888892 : f32
    %41 = vector.broadcast %cst_10 : f32 to vector<128x256xf32>
    %42 = arith.addf %41, %40 : vector<128x256xf32>
    %43 = arith.mulf %27, %42 : vector<128x256xf32>
    %cst_11 = arith.constant 0.0416666679 : f32
    %44 = vector.broadcast %cst_11 : f32 to vector<128x256xf32>
    %45 = arith.addf %44, %43 : vector<128x256xf32>
    %46 = arith.mulf %27, %45 : vector<128x256xf32>
    %cst_12 = arith.constant -5.000000e-01 : f32
    %47 = vector.broadcast %cst_12 : f32 to vector<128x256xf32>
    %48 = arith.addf %47, %46 : vector<128x256xf32>
    %49 = arith.mulf %27, %48 : vector<128x256xf32>
    %cst_13 = arith.constant 1.000000e+00 : f32
    %50 = vector.broadcast %cst_13 : f32 to vector<128x256xf32>
    %51 = arith.addf %50, %49 : vector<128x256xf32>
    %52 = arith.fptosi %21 : vector<128x256xf32> to vector<128x256xi32>
    %c3_i32 = arith.constant 3 : i32
    %53 = vector.broadcast %c3_i32 : i32 to vector<128x256xi32>
    %54 = arith.andi %52, %53 : vector<128x256xi32>
    %c1_i32 = arith.constant 1 : i32
    %55 = vector.broadcast %c1_i32 : i32 to vector<128x256xi32>
    %56 = arith.andi %54, %55 : vector<128x256xi32>
    %c1_i32_14 = arith.constant 1 : i32
    %57 = vector.broadcast %c1_i32_14 : i32 to vector<128x256xi32>
    %58 = arith.cmpi eq, %56, %57 : vector<128x256xi32>
    %59 = arith.select %58, %51, %38 : vector<128x256xi1>, vector<128x256xf32>
    %60 = arith.select %58, %38, %51 : vector<128x256xi1>, vector<128x256xf32>
    %c2_i32 = arith.constant 2 : i32
    %61 = vector.broadcast %c2_i32 : i32 to vector<128x256xi32>
    %62 = arith.cmpi sge, %54, %61 : vector<128x256xi32>
    %cst_15 = arith.constant 0.000000e+00 : f32
    %63 = vector.broadcast %cst_15 : f32 to vector<128x256xf32>
    %64 = arith.subf %63, %59 : vector<128x256xf32>
    %65 = arith.select %62, %64, %59 : vector<128x256xi1>, vector<128x256xf32>
    %c1_i32_16 = arith.constant 1 : i32
    %66 = vector.broadcast %c1_i32_16 : i32 to vector<128x256xi32>
    %67 = arith.cmpi eq, %54, %66 : vector<128x256xi32>
    %c2_i32_17 = arith.constant 2 : i32
    %68 = vector.broadcast %c2_i32_17 : i32 to vector<128x256xi32>
    %69 = arith.cmpi eq, %54, %68 : vector<128x256xi32>
    %70 = arith.ori %67, %69 : vector<128x256xi1>
    %cst_18 = arith.constant 0.000000e+00 : f32
    %71 = vector.broadcast %cst_18 : f32 to vector<128x256xf32>
    %72 = arith.subf %71, %60 : vector<128x256xf32>
    %73 = arith.select %70, %72, %60 : vector<128x256xi1>, vector<128x256xf32>
    %c0_19 = arith.constant 0 : index
    %c0_20 = arith.constant 0 : index
    %74 = vector.load %arg3[%c0_19, %c0_20] : memref<128x512xf32, #tpu.memory_space<vmem>>, vector<128x256xf32>
    tpu.vector_store %arg3[%c0_19, %c0_20], %65 {strides = array<i32>} : memref<128x512xf32, #tpu.memory_space<vmem>>, vector<128x256xf32>,
    %c0_21 = arith.constant 0 : index
    %c256 = arith.constant 256 : index
    %75 = vector.load %arg3[%c0_21, %c256] : memref<128x512xf32, #tpu.memory_space<vmem>>, vector<128x256xf32>
    tpu.vector_store %arg3[%c0_21, %c256], %73 {strides = array<i32>} : memref<128x512xf32, #tpu.memory_space<vmem>>, vector<128x256xf32>,
    return
  }
  func.func @transform_0(%arg0: i32) -> (i32, i32) {
    %c0_i32 = arith.constant 0 : i32
    %c0_i32_0 = arith.constant 0 : i32
    return %arg0, %c0_i32 : i32, i32
  }
  func.func @transform_1(%arg0: i32) -> (i32, i32) {
    %c0_i32 = arith.constant 0 : i32
    %c0_i32_0 = arith.constant 0 : i32
    %c0_i32_1 = arith.constant 0 : i32
    return %c0_i32, %c0_i32_0 : i32, i32
  }
  func.func @transform_2(%arg0: i32) -> (i32, i32) {
    %c0_i32 = arith.constant 0 : i32
    %c0_i32_0 = arith.constant 0 : i32
    return %arg0, %c0_i32 : i32, i32
  }
}

</mosaic_0001>

<bundles_post_ra>
// kernel: tpu_custom_call.1
= control target key start
LH: loop header
LB: loop body
LE: loop exit
PB: predicated region body
PF: predicated region fallthrough
CT: control target
= control target key end

     0   :  { %v1816_v2 = vmov 0   ;;  %s3222_s0 = inlined_call_operand.vmem [shape: f32[128,3], index: 0, kind: input, shape index: {}]   ;;  %s3223_s1 = inlined_call_operand.vmem [shape: f32[3,256], index: 1, kind: input, shape index: {}]   ;;  %s3224_s2 = inlined_call_operand.hbm [shape: f32[128,512], index: 2, kind: output, shape index: {}]  }
   0x1   :  { %v14_v0 = vld [vmem:[%s3222_s0 + $0x10] sm:$0xff]  ;;  %v12_v1 = vld [vmem:[%s3222_s0] sm:$0xff]  ;;  %1787 = vset.pattern.permute.xlu1 %v1816_v2  ;;  %1786 = vset.pattern.permute.xlu0 %v1816_v2  ;;  %v15_v3 = vld [vmem:[%s3222_s0 + $0x18] sm:$0xff] }
   0x2   :  { %41 = vperm.xlu1 %1787, %v14_v0   ;;  %31 = vperm.xlu0 %1786, %v12_v1   ;;  %v13_v4 = vld [vmem:[%s3222_s0 + $0x8] sm:$0xff] }
   0x3   :  { %7 = vsyncpa [#allocation3], 0  ;;  %v17_v5 = vld [vmem:[%s3222_s0 + $0x28] sm:$0xff]  ;;  %v16_v6 = vld [vmem:[%s3222_s0 + $0x20] sm:$0xff]  ;;  %v1817_v17 = vmov 1   ;;  %v1818_v18 = vmov 2   ;;  %v110_v19 = vlaneseq }
   0x4   :  { %v19_v7 = vld [vmem:[%s3222_s0 + $0x38] sm:$0xff]  ;;  %v18_v8 = vld [vmem:[%s3222_s0 + $0x30] sm:$0xff]  ;;  %v21_v9 = vld [vmem:[%s3222_s0 + $0x48] sm:$0xff] }
   0x5   :  { %v20_v10 = vld [vmem:[%s3222_s0 + $0x40] sm:$0xff]  ;;  %v23_v11 = vld [vmem:[%s3222_s0 + $0x58] sm:$0xff]  ;;  %v22_v12 = vld [vmem:[%s3222_s0 + $0x50] sm:$0xff]  ;;  %v1885_v20 = vshrl.u32 %v110_v19, 7 }
   0x6   :  { %46 = vperm.xlu1 %1787, %v15_v3   ;;  %36 = vperm.xlu0 %1786, %v13_v4   ;;  %v25_v13 = vld [vmem:[%s3222_s0 + $0x68] sm:$0xff]  ;;  %v24_v14 = vld [vmem:[%s3222_s0 + $0x60] sm:$0xff]  ;;  %v27_v15 = vld [vmem:[%s3222_s0 + $0x78] sm:$0xff] }
   0x7   :  { %v26_v16 = vld [vmem:[%s3222_s0 + $0x70] sm:$0xff]  ;;  %v112_v21 = vsub.s32 0, %v1885_v20  ;;  %v116_v22 = vsub.s32 4, %v1885_v20  ;;  %v1892_v23 = vld [vmem:[%s3223_s1] sm:$0x77]  ;;  %s1819_s1 = smov [#allocation2]  }
   0x8   :  { %s1641_s14 = sshll.u32 %s1819_s1, 4  ;;  %s1642_s14 = int_to_ptr.vmem [resolvable:$true] %s1641_s14 }
   0x9   :  { %v113_v24 = vrot.slane %v1892_v23, %v112_v21  ;;  %v117_v25 = vrot.slane %v1892_v23, %v116_v22  ;;  %s1792_s15 = scalar_lea.vmem %s1642_s14, 8192  ;;  %p1797_p1 = scmp.lt.s32.totalorder %s1642_s14, %s1642_s14 }
   0xa   :  { %56 = vperm.xlu1 %1787, %v17_v5   ;;  %51 = vperm.xlu0 %1786, %v16_v6   ;;  %p1793_p0 = scmp.ne.s32.totalorder %s1642_s14, %s1792_s15  ;;  %p1798_p2 = scmp.lt.s32.totalorder %s1792_s15, %s1792_s15 }
   0xb   :  { %v1900_v28 = vrot.slane %v113_v24, %v112_v21  ;;  %v1902_v29 = vrot.slane %v117_v25, %v112_v21 }
   0xc   :  { %p1799_p3 = por %p1798_p2, %p1797_p1 }
   0xe   :  { %66 = vperm.xlu1 %1787, %v19_v7   ;;  %61 = vperm.xlu0 %1786, %v18_v8   ;;  %p1800_p4 = pnand %p1799_p3, %p1793_p0 }
  0x12   :  { %76 = vperm.xlu1 %1787, %v21_v9   ;;  %71 = vperm.xlu0 %1786, %v20_v10  }
  0x16   :  { %86 = vperm.xlu1 %1787, %v23_v11   ;;  %81 = vperm.xlu0 %1786, %v22_v12  }
  0x1a   :  { %96 = vperm.xlu1 %1787, %v25_v13   ;;  %91 = vperm.xlu0 %1786, %v24_v14  }
  0x1e   :  { %106 = vperm.xlu1 %1787, %v27_v15   ;;  %101 = vperm.xlu0 %1786, %v26_v16  }
  0x22   :  { %1789 = vset.pattern.permute.xlu1 %v1817_v17  ;;  %1788 = vset.pattern.permute.xlu0 %v1817_v17 }
  0x23   :  { %165 = vperm.xlu1 %1789, %v13_v4   ;;  %161 = vperm.xlu0 %1788, %v12_v1  }
  0x27   :  { %169 = vperm.xlu1 %1789, %v14_v0   ;;  %173 = vperm.xlu0 %1788, %v15_v3  }
  0x2b   :  { %177 = vperm.xlu1 %1789, %v16_v6   ;;  %181 = vperm.xlu0 %1788, %v17_v5  }
  0x2f   :  { %185 = vperm.xlu1 %1789, %v18_v8   ;;  %189 = vperm.xlu0 %1788, %v19_v7  }
  0x33   :  { %193 = vperm.xlu1 %1789, %v20_v10   ;;  %197 = vperm.xlu0 %1788, %v21_v9  }
  0x37   :  { %201 = vperm.xlu1 %1789, %v22_v12   ;;  %205 = vperm.xlu0 %1788, %v23_v11  }
  0x3b   :  { %209 = vperm.xlu1 %1789, %v24_v14   ;;  %213 = vperm.xlu0 %1788, %v25_v13  }
  0x3f   :  { %217 = vperm.xlu1 %1789, %v26_v16   ;;  %221 = vperm.xlu0 %1788, %v27_v15  }
  0x43   :  { %1790 = vset.pattern.permute.xlu1 %v1818_v18  ;;  %1791 = vset.pattern.permute.xlu0 %v1818_v18 }
  0x44   :  { %307 = vperm.xlu1 %1790, %v12_v1   ;;  %311 = vperm.xlu0 %1791, %v13_v4   ;;  %v230_v1 = vsub.s32 5, %v1885_v20 }
  0x48   :  { %315 = vperm.xlu1 %1790, %v14_v0   ;;  %323 = vperm.xlu0 %1791, %v16_v6   ;;  %v226_v0 = vsub.s32 1, %v1885_v20 }
  0x4a   :  { %v227_v6 = vrot.slane %v1892_v23, %v226_v0 }
  0x4c   :  { %319 = vperm.xlu1 %1790, %v15_v3   ;;  %331 = vperm.xlu0 %1791, %v18_v8  }
  0x50   :  { %327 = vperm.xlu1 %1790, %v17_v5   ;;  %339 = vperm.xlu0 %1791, %v20_v10   ;;  %v1970_v10 = vrot.slane %v227_v6, %v226_v0 }
  0x54   :  { %335 = vperm.xlu1 %1790, %v19_v7   ;;  %347 = vperm.xlu0 %1791, %v22_v12   ;;  %v231_v7 = vrot.slane %v1892_v23, %v230_v1 }
  0x58   :  { %343 = vperm.xlu1 %1790, %v21_v9   ;;  %355 = vperm.xlu0 %1791, %v24_v14  }
  0x5c   :  { %351 = vperm.xlu1 %1790, %v23_v11   ;;  %363 = vperm.xlu0 %1791, %v26_v16   ;;  %v1972_v11 = vrot.slane %v231_v7, %v226_v0 }
  0x60   :  { %359 = vperm.xlu1 %1790, %v25_v13  }
  0x64   :  { %367 = vperm.xlu1 %1790, %v27_v15  }
  0x81   :  { %v1896_v26 = vpop.permute.xlu1 %41  ;;  %v1898_v27 = vpop.permute.xlu0 %31 }
  0x85   :  { %v47_v30 = vpop.permute.xlu1 %46  ;;  %v1904_v31 = vpop.permute.xlu0 %36 }
  0x86   :  { %v134_v32 = vmul.f32 %v1900_v28, %v47_v30  ;;  %v135_v33 = vmul.f32 %v1902_v29, %v47_v30 }
  0x89   :  { %v57_v34 = vpop.permute.xlu1 %56  ;;  %v52_v35 = vpop.permute.xlu0 %51 }
  0x8a   :  { %v138_v36 = vmul.f32 %v1900_v28, %v57_v34  ;;  %v139_v37 = vmul.f32 %v1902_v29, %v57_v34  ;;  %v136_v18 = vmul.f32 %v1900_v28, %v52_v35  ;;  %v137_v19 = vmul.f32 %v1902_v29, %v52_v35 }
  0x8d   :  { %v67_v38 = vpop.permute.xlu1 %66  ;;  %v62_v39 = vpop.permute.xlu0 %61 }
  0x8e   :  { %v142_v40 = vmul.f32 %v1900_v28, %v67_v38  ;;  %v143_v41 = vmul.f32 %v1902_v29, %v67_v38  ;;  %v140_v42 = vmul.f32 %v1900_v28, %v62_v39  ;;  %v141_v43 = vmul.f32 %v1902_v29, %v62_v39 }
  0x91   :  { %v77_v44 = vpop.permute.xlu1 %76  ;;  %v72_v45 = vpop.permute.xlu0 %71 }
  0x92   :  { %v1915_v46 = vmul.f32 %v1900_v28, %v77_v44  ;;  %v1918_v47 = vmul.f32 %v1902_v29, %v77_v44  ;;  %v1921_v48 = vmul.f32 %v1900_v28, %v72_v45  ;;  %v1924_v49 = vmul.f32 %v1902_v29, %v72_v45 }
  0x95   :  { %v87_v50 = vpop.permute.xlu1 %86  ;;  %v82_v51 = vpop.permute.xlu0 %81 }
  0x96   :  { %v1927_v52 = vmul.f32 %v1900_v28, %v87_v50  ;;  %v1930_v53 = vmul.f32 %v1902_v29, %v87_v50  ;;  %v1933_v54 = vmul.f32 %v1900_v28, %v82_v51  ;;  %v1936_v55 = vmul.f32 %v1902_v29, %v82_v51 }
  0x99   :  { %v97_v56 = vpop.permute.xlu1 %96  ;;  %v92_v57 = vpop.permute.xlu0 %91 }
  0x9a   :  { %v1939_v58 = vmul.f32 %v1900_v28, %v97_v56  ;;  %v1942_v59 = vmul.f32 %v1902_v29, %v97_v56  ;;  %v1945_v60 = vmul.f32 %v1900_v28, %v92_v57  ;;  %v1948_v61 = vmul.f32 %v1902_v29, %v92_v57 }
  0x9d   :  { %v107_v62 = vpop.permute.xlu1 %106  ;;  %v102_v63 = vpop.permute.xlu0 %101 }
  0x9e   :  { %v1953_v2 = vmul.f32 %v1900_v28, %v107_v62  ;;  %v1956_v3 = vmul.f32 %v1902_v29, %v107_v62  ;;  %v1959_v4 = vmul.f32 %v1900_v28, %v102_v63  ;;  %v1962_v5 = vmul.f32 %v1902_v29, %v102_v63 }
  0xa2   :  { %v1966_v8 = vpop.permute.xlu1 %165  ;;  %v1968_v9 = vpop.permute.xlu0 %161 }
  0xa6   :  { %v1974_v12 = vpop.permute.xlu1 %169  ;;  %v174_v13 = vpop.permute.xlu0 %173 }
  0xa7   :  { %v248_v14 = vmul.f32 %v1970_v10, %v174_v13  ;;  %v249_v15 = vmul.f32 %v1972_v11, %v174_v13 }
  0xa9   :  { %v1978_v16 = vadd.f32 %v248_v14, %v134_v32  ;;  %v1980_v17 = vadd.f32 %v249_v15, %v135_v33  ;;  %v372_v14 = vsub.s32 2, %v1885_v20 }
  0xaa   :  { %v178_v21 = vpop.permute.xlu1 %177  ;;  %v182_v22 = vpop.permute.xlu0 %181 }
  0xab   :  { %v250_v24 = vmul.f32 %v1970_v10, %v178_v21  ;;  %v251_v25 = vmul.f32 %v1972_v11, %v178_v21  ;;  %v252_v30 = vmul.f32 %v1970_v10, %v182_v22  ;;  %v253_v34 = vmul.f32 %v1972_v11, %v182_v22 }
  0xad   :  { %v1988_v38 = vadd.f32 %v250_v24, %v136_v18  ;;  %v1990_v32 = vadd.f32 %v251_v25, %v137_v19  ;;  %v1992_v33 = vadd.f32 %v252_v30, %v138_v36  ;;  %v1994_v39 = vadd.f32 %v253_v34, %v139_v37 }
  0xae   :  { %v186_v44 = vpop.permute.xlu1 %185  ;;  %v190_v35 = vpop.permute.xlu0 %189  ;;  %v373_v24 = vrot.slane %v1892_v23, %v372_v14 }
  0xaf   :  { %v254_v45 = vmul.f32 %v1970_v10, %v186_v44  ;;  %v255_v50 = vmul.f32 %v1972_v11, %v186_v44  ;;  %v256_v51 = vmul.f32 %v1970_v10, %v190_v35  ;;  %v257_v56 = vmul.f32 %v1972_v11, %v190_v35 }
  0xb1   :  { %v2000_v57 = vadd.f32 %v254_v45, %v140_v42  ;;  %v2002_v62 = vadd.f32 %v255_v50, %v141_v43  ;;  %v2004_v63 = vadd.f32 %v256_v51, %v142_v40  ;;  %v2006_v36 = vadd.f32 %v257_v56, %v143_v41 }
  0xb2   :  { %v194_v37 = vpop.permute.xlu1 %193  ;;  %v198_v0 = vpop.permute.xlu0 %197  ;;  %v376_v42 = vsub.s32 6, %v1885_v20  ;;  %v2048_v50 = vrot.slane %v373_v24, %v372_v14 }
  0xb3   :  { %v258_v1 = vmul.f32 %v1970_v10, %v194_v37  ;;  %v259_v6 = vmul.f32 %v1972_v11, %v194_v37  ;;  %v260_v7 = vmul.f32 %v1970_v10, %v198_v0  ;;  %v261_v13 = vmul.f32 %v1972_v11, %v198_v0 }
  0xb4   :  { %v244_v37 = vmul.f32 %v1970_v10, %v1966_v8  ;;  %v245_v0 = vmul.f32 %v1972_v11, %v1966_v8  ;;  %v129_v8 = vmul.f32 %v1902_v29, %v1898_v27 }
  0xb5   :  { %v2015_v43 = vadd.f32 %v258_v1, %v1921_v48  ;;  %v2018_v40 = vadd.f32 %v259_v6, %v1924_v49  ;;  %v2021_v41 = vadd.f32 %v260_v7, %v1915_v46  ;;  %v2024_v15 = vadd.f32 %v261_v13, %v1918_v47 }
  0xb6   :  { %v202_v18 = vpop.permute.xlu1 %201  ;;  %v206_v19 = vpop.permute.xlu0 %205  ;;  %v377_v49 = vrot.slane %v1892_v23, %v376_v42  ;;  %v242_v1 = vmul.f32 %v1970_v10, %v1968_v9  ;;  %v130_v42 = vmul.f32 %v1900_v28, %v1904_v31 }
  0xb7   :  { %v262_v21 = vmul.f32 %v1970_v10, %v202_v18  ;;  %v263_v22 = vmul.f32 %v1972_v11, %v202_v18  ;;  %v264_v20 = vmul.f32 %v1970_v10, %v206_v19  ;;  %v265_v48 = vmul.f32 %v1972_v11, %v206_v19 }
  0xb9   :  { %v2033_v46 = vadd.f32 %v262_v21, %v1933_v54  ;;  %v2036_v47 = vadd.f32 %v263_v22, %v1936_v55  ;;  %v2039_v25 = vadd.f32 %v264_v20, %v1927_v52  ;;  %v2042_v30 = vadd.f32 %v265_v48, %v1930_v53 }
  0xba   :  { %v210_v34 = vpop.permute.xlu1 %209  ;;  %v214_v44 = vpop.permute.xlu0 %213  ;;  %v2050_v55 = vrot.slane %v377_v49, %v372_v14  ;;  %v128_v14 = vmul.f32 %v1900_v28, %v1898_v27  ;;  %v276_v20 = vadd.f32 %v244_v37, %v130_v42 }
  0xbb   :  { %v266_v35 = vmul.f32 %v1970_v10, %v210_v34  ;;  %v267_v45 = vmul.f32 %v1972_v11, %v210_v34  ;;  %v268_v23 = vmul.f32 %v1970_v10, %v214_v44  ;;  %v269_v54 = vmul.f32 %v1972_v11, %v214_v44 }
  0xbc   :  { %v274_v48 = vadd.f32 %v242_v1, %v128_v14  ;;  %v246_v1 = vmul.f32 %v1970_v10, %v1974_v12 }
  0xbd   :  { %v2053_v52 = vadd.f32 %v266_v35, %v1945_v60  ;;  %v2056_v53 = vadd.f32 %v267_v45, %v1948_v61  ;;  %v2059_v51 = vadd.f32 %v268_v23, %v1939_v58  ;;  %v2062_v56 = vadd.f32 %v269_v54, %v1942_v59 }
  0xbe   :  { %v243_v60 = vmul.f32 %v1972_v11, %v1968_v9  ;;  %v218_v61 = vpop.permute.xlu1 %217  ;;  %v222_v6 = vpop.permute.xlu0 %221  ;;  %v131_v9 = vmul.f32 %v1902_v29, %v1904_v31 }
  0xbf   :  { %v270_v58 = vmul.f32 %v1970_v10, %v218_v61  ;;  %v271_v7 = vmul.f32 %v1972_v11, %v218_v61  ;;  %v272_v59 = vmul.f32 %v1970_v10, %v222_v6  ;;  %v273_v13 = vmul.f32 %v1972_v11, %v222_v6 }
  0xc0   :  { %v277_v27 = vadd.f32 %v245_v0, %v131_v9  ;;  %v275_v24 = vadd.f32 %v243_v60, %v129_v8  ;;  %v247_v8 = vmul.f32 %v1972_v11, %v1974_v12 }
  0xc1   :  { %v2085_v18 = vadd.f32 %v270_v58, %v1959_v4  ;;  %v2088_v19 = vadd.f32 %v271_v7, %v1962_v5  ;;  %v2091_v21 = vadd.f32 %v272_v59, %v1953_v2  ;;  %v2094_v22 = vadd.f32 %v273_v13, %v1956_v3 }
  0xc3   :  { %v308_v49 = vpop.permute.xlu1 %307  ;;  %v312_v34 = vpop.permute.xlu0 %311 }
  0xc4   :  { %v388_v31 = vmul.f32 %v2048_v50, %v308_v49  ;;  %v389_v4 = vmul.f32 %v2050_v55, %v308_v49  ;;  %v390_v44 = vmul.f32 %v2048_v50, %v312_v34  ;;  %v391_v5 = vmul.f32 %v2050_v55, %v312_v34 }
  0xc6   :  { %v420_v35 = vadd.f32 %v388_v31, %v274_v48  ;;  %v421_v2 = vadd.f32 %v389_v4, %v275_v24  ;;  %v422_v45 = vadd.f32 %v390_v44, %v276_v20  ;;  %v423_v23 = vadd.f32 %v391_v5, %v277_v27 }
  0xc7   :  { %v132_v20 = vmul.f32 %v1900_v28, %v1896_v26  ;;  %v133_v27 = vmul.f32 %v1902_v29, %v1896_v26  ;;  %v316_v24 = vpop.permute.xlu1 %315  ;;  %v324_v44 = vpop.permute.xlu0 %323 }
  0xc8   :  { %v452_v3 = vmul.f32 4.0, %v420_v35  ;;  %v453_v54 = vmul.f32 4.0, %v421_v2  ;;  %v454_v37 = vmul.f32 4.0, %v422_v45  ;;  %v455_v0 = vmul.f32 4.0, %v423_v23 }
  0xc9   :  { %v278_v5 = vadd.f32 %v246_v1, %v132_v20  ;;  %v392_v26 = vmul.f32 %v2048_v50, %v316_v24 }
  0xca   :  { %v1652_v60 = vround.rtne.f32 %v452_v3  ;;  %v1653_v61 = vround.rtne.f32 %v453_v54  ;;  %v1686_v6 = vcvt.f32.s32 %v452_v3  ;;  %v1689_v58 = vcvt.f32.s32 %v453_v54 }
  0xcb   :  { %v1654_v7 = vround.rtne.f32 %v454_v37  ;;  %v1655_v59 = vround.rtne.f32 %v455_v0  ;;  %v1692_v13 = vcvt.f32.s32 %v454_v37  ;;  %v1695_v14 = vcvt.f32.s32 %v455_v0 }
  0xcc   :  { %v516_v42 = vmul.f32 0.25, %v1652_v60  ;;  %v517_v9 = vmul.f32 0.25, %v1653_v61  ;;  %v2108_v31 = vand.u32 3, %v1686_v6  ;;  %v2110_v4 = vand.u32 3, %v1689_v58 }
  0xcd   :  { %v518_v10 = vmul.f32 0.25, %v1654_v7  ;;  %v519_v48 = vmul.f32 0.25, %v1655_v59  ;;  %v2112_v11 = vand.u32 3, %v1692_v13  ;;  %v2114_v12 = vand.u32 3, %v1695_v14 }
  0xce   :  { %v548_v49 = vsub.f32 %v420_v35, %v516_v42  ;;  %v549_v34 = vsub.f32 %v421_v2, %v517_v9  ;;  %v279_v3 = vadd.f32 %v247_v8, %v133_v27  ;;  %v393_v2 = vmul.f32 %v2050_v55, %v316_v24 }
  0xcf   :  { %v550_v29 = vsub.f32 %v422_v45, %v518_v10  ;;  %v551_v35 = vsub.f32 %v423_v23, %v519_v48  ;;  %v396_v37 = vmul.f32 %v2048_v50, %v324_v44  ;;  %v1188_v60 = vand.u32 1, %v2108_v31 }
  0xd0   :  { %v2116_v28 = vmul.f32 6.2831855, %v548_v49  ;;  %v2118_v54 = vmul.f32 6.2831855, %v549_v34  ;;  %v1189_v61 = vand.u32 1, %v2110_v4  ;;  %v397_v14 = vmul.f32 %v2050_v55, %v324_v44 }
  0xd1   :  { %v2133_v6 = vmul.f32 6.2831855, %v550_v29  ;;  %v2135_v45 = vmul.f32 6.2831855, %v551_v35  ;;  %v2152_v20 = vadd.f32 %v392_v26, %v278_v5  ;;  %v2154_v24 = vadd.f32 %v393_v2, %v279_v3 }
  0xd2   :  { %v2125_v0 = vmul.f32 %v2116_v28, %v2116_v28  ;;  %v2129_v1 = vmul.f32 %v2118_v54, %v2118_v54  ;;  %v2159_v29 = vadd.f32 %v396_v37, %v1988_v38  ;;  %v2168_v38 = vadd.f32 %v397_v14, %v1990_v32 }
  0xd3   :  { %v2146_v42 = vmul.f32 %v2133_v6, %v2133_v6  ;;  %v2150_v9 = vmul.f32 %v2135_v45, %v2135_v45  ;;  %vm2170_vm0 = vcmp.eq.s32.totalorder %v1188_v60, 1  ;;  %vm1412_vm1 = vcmp.eq.s32.totalorder %v2108_v31, 1 }
  0xd4   :  { %v644_v7 = vmul.f32 -0.0001984127, %v2125_v0  ;;  %v645_v59 = vmul.f32 -0.0001984127, %v2129_v1  ;;  %v868_v13 = vmul.f32 2.4801588e-05, %v2125_v0 }
  0xd5   :  { %v869_v8 = vmul.f32 2.4801588e-05, %v2129_v1  ;;  %v646_v34 = vmul.f32 -0.0001984127, %v2146_v42  ;;  %v647_v44 = vmul.f32 -0.0001984127, %v2150_v9 }
  0xd6   :  { %v676_v27 = vadd.f32 0.008333334, %v644_v7  ;;  %v677_v10 = vadd.f32 0.008333334, %v645_v59  ;;  %v900_v48 = vadd.f32 -0.0013888889, %v868_v13 }
  0xd7   :  { %v901_v49 = vadd.f32 -0.0013888889, %v869_v8  ;;  %v870_v26 = vmul.f32 2.4801588e-05, %v2146_v42  ;;  %v678_v3 = vadd.f32 0.008333334, %v646_v34 }
  0xd8   :  { %v708_v35 = vmul.f32 %v676_v27, %v2125_v0  ;;  %v709_v58 = vmul.f32 %v677_v10, %v2129_v1  ;;  %v932_v5 = vmul.f32 %v900_v48, %v2125_v0  ;;  %v679_v2 = vadd.f32 0.008333334, %v647_v44 }
  0xd9   :  { %v933_v7 = vmul.f32 %v901_v49, %v2129_v1  ;;  %v871_v59 = vmul.f32 2.4801588e-05, %v2150_v9  ;;  %vm1444_vm2 = vcmp.eq.s32.totalorder %v2108_v31, 2  ;;  %v710_v10 = vmul.f32 %v678_v3, %v2146_v42 }
  0xda   :  { %v740_v13 = vadd.f32 -0.16666667, %v708_v35  ;;  %v741_v8 = vadd.f32 -0.16666667, %v709_v58  ;;  %v964_v23 = vadd.f32 0.041666668, %v932_v5  ;;  %v711_v48 = vmul.f32 %v679_v2, %v2150_v9  ;;  %vm1476_vm14 = vmor %vm1412_vm1, %vm1444_vm2 }
  0xdb   :  { %v965_v37 = vadd.f32 0.041666668, %v933_v7  ;;  %v902_v49 = vadd.f32 -0.0013888889, %v870_v26  ;;  %vm2181_vm3 = vcmp.eq.s32.totalorder %v1189_v61, 1  ;;  %vm1413_vm4 = vcmp.eq.s32.totalorder %v2110_v4, 1 }
  0xdc   :  { %v772_v58 = vmul.f32 %v740_v13, %v2125_v0  ;;  %v773_v34 = vmul.f32 %v741_v8, %v2129_v1  ;;  %v996_v32 = vmul.f32 %v964_v23, %v2125_v0  ;;  %vm1445_vm5 = vcmp.eq.s32.totalorder %v2110_v4, 2 }
  0xdd   :  { %v903_v14 = vadd.f32 -0.0013888889, %v871_v59  ;;  %v997_v44 = vmul.f32 %v965_v37, %v2129_v1  ;;  %v742_v35 = vadd.f32 -0.16666667, %v710_v10  ;;  %v743_v5 = vadd.f32 -0.16666667, %v711_v48  ;;  %vm1477_vm15 = vmor %vm1413_vm4, %vm1445_vm5 }
  0xde   :  { %v934_v26 = vmul.f32 %v902_v49, %v2146_v42  ;;  %v804_v7 = vadd.f32 1.0, %v772_v58  ;;  %v805_v3 = vadd.f32 1.0, %v773_v34  ;;  %v1028_v2 = vadd.f32 -0.5, %v996_v32 }
  0xdf   :  { %vm1316_vm6 = vcmp.ge.s32.totalorder %v2108_v31, 2  ;;  %v935_v61 = vmul.f32 %v903_v14, %v2150_v9  ;;  %v1029_v23 = vadd.f32 -0.5, %v997_v44  ;;  %vm1317_vm7 = vcmp.ge.s32.totalorder %v2110_v4, 2 }
  0xe0   :  { %v774_v13 = vmul.f32 %v742_v35, %v2146_v42  ;;  %v775_v59 = vmul.f32 %v743_v5, %v2150_v9  ;;  %v966_v8 = vadd.f32 0.041666668, %v934_v26  ;;  %v836_v37 = vmul.f32 %v804_v7, %v2116_v28 }
  0xe1   :  { %v837_v10 = vmul.f32 %v805_v3, %v2118_v54  ;;  %v1060_v48 = vmul.f32 %v1028_v2, %v2125_v0  ;;  %v967_v49 = vadd.f32 0.041666668, %v935_v61  ;;  %v1061_v58 = vmul.f32 %v1029_v23, %v2129_v1 }
  0xe2   :  { %v806_v34 = vadd.f32 1.0, %v774_v13  ;;  %v807_v32 = vadd.f32 1.0, %v775_v59  ;;  %v998_v14 = vmul.f32 %v966_v8, %v2146_v42  ;;  %v3229_v44 = vand.u32 1, %v2112_v11 }
  0xe3   :  { %v1092_v5 = vadd.f32 1.0, %v1060_v48  ;;  %v999_v28 = vmul.f32 %v967_v49, %v2150_v9  ;;  %v3232_v54 = vand.u32 1, %v2114_v12  ;;  %vm1414_vm10 = vcmp.eq.s32.totalorder %v2112_v11, 1 }
  0xe4   :  { %vm2201_vm8 = vcmp.eq.s32.totalorder %v3229_v44, 1  ;;  %v1093_v1 = vadd.f32 1.0, %v1061_v58  ;;  %v838_v26 = vmul.f32 %v806_v34, %v2133_v6  ;;  %v839_v7 = vmul.f32 %v807_v32, %v2135_v45 }
  0xe5   :  { %vm2208_vm9 = vcmp.eq.s32.totalorder %v3232_v54, 1  ;;  %v1030_v3 = vadd.f32 -0.5, %v998_v14  ;;  %v1252_v2 = vsel %vm2170_vm0, %v1092_v5, %v836_v37  ;;  %v1284_v61 = vsel %vm2170_vm0, %v836_v37, %v1092_v5 }
  0xe6   :  { %v1031_v23 = vadd.f32 -0.5, %v999_v28  ;;  %vm1318_vm11 = vcmp.ge.s32.totalorder %v2112_v11, 2  ;;  %vm1319_vm12 = vcmp.ge.s32.totalorder %v2114_v12, 2  ;;  %vm1415_vm13 = vcmp.eq.s32.totalorder %v2114_v12, 1 }
  0xe7   :  { %v1253_v13 = vsel %vm2181_vm3, %v1093_v1, %v837_v10  ;;  %v1285_v6 = vsel %vm2181_vm3, %v837_v10, %v1093_v1  ;;  %v1348_v45 = vsub.f32 0.0, %v1252_v2  ;;  %v1508_v59 = vsub.f32 0.0, %v1284_v61 }
  0xe8   :  { %v1349_v8 = vsub.f32 0.0, %v1253_v13  ;;  %v1509_v27 = vsub.f32 0.0, %v1285_v6  ;;  %v1062_v37 = vmul.f32 %v1030_v3, %v2146_v42  ;;  %v1063_v48 = vmul.f32 %v1031_v23, %v2150_v9 }
  0xe9   :  { %v1380_v49 = vsel %vm1316_vm6, %v1348_v45, %v1252_v2  ;;  %v1540_v60 = vsel %vm1476_vm14, %v1508_v59, %v1284_v61  ;;  %vm1446_vm0 = vcmp.eq.s32.totalorder %v2112_v11, 2  ;;  %vm1447_vm3 = vcmp.eq.s32.totalorder %v2114_v12, 2 }
  0xea   :  { %v1381_v10 = vsel %vm1317_vm7, %v1349_v8, %v1253_v13  ;;  %v1541_v58 = vsel %vm1477_vm15, %v1509_v27, %v1285_v6  ;;  %1572 = vst [vmem:[#allocation2] sm:$0xff] %v1380_v49  ;;  %1604 = vst [vmem:[#allocation2 + $0x10] sm:$0xff] %v1540_v60  ;;  %v1094_v42 = vadd.f32 1.0, %v1062_v37  ;;  %v1095_v9 = vadd.f32 1.0, %v1063_v48 }
  0xeb   :  { %1573 = vst [vmem:[#allocation2 + $0x8] sm:$0xff] %v1381_v10  ;;  %1605 = vst [vmem:[#allocation2 + $0x18] sm:$0xff] %v1541_v58  ;;  %v456_v31 = vmul.f32 4.0, %v2152_v20  ;;  %v457_v34 = vmul.f32 4.0, %v2154_v24  ;;  %v460_v32 = vmul.f32 4.0, %v2159_v29  ;;  %v461_v14 = vmul.f32 4.0, %v2168_v38 }
  0xec   :  { %v1254_v44 = vsel %vm2201_vm8, %v1094_v42, %v838_v26  ;;  %v1255_v4 = vsel %vm2208_vm9, %v1095_v9, %v839_v7  ;;  %v1286_v5 = vsel %vm2201_vm8, %v838_v26, %v1094_v42  ;;  %v1287_v28 = vsel %vm2208_vm9, %v839_v7, %v1095_v9  ;;  %vm1478_vm1 = vmor %vm1414_vm10, %vm1446_vm0 }
  0xed   :  { %v1350_v54 = vsub.f32 0.0, %v1254_v44  ;;  %v1351_v1 = vsub.f32 0.0, %v1255_v4  ;;  %v1510_v3 = vsub.f32 0.0, %v1286_v5  ;;  %v1511_v2 = vsub.f32 0.0, %v1287_v28  ;;  %vm1479_vm2 = vmor %vm1415_vm13, %vm1447_vm3 }
  0xee   :  { %v1656_v61 = vround.rtne.f32 %v456_v31  ;;  %v1657_v35 = vround.rtne.f32 %v457_v34  ;;  %v1698_v26 = vcvt.f32.s32 %v456_v31  ;;  %v1701_v23 = vcvt.f32.s32 %v457_v34 }
  0xef   :  { %v1382_v0 = vsel %vm1318_vm11, %v1350_v54, %v1254_v44  ;;  %v1383_v7 = vsel %vm1319_vm12, %v1351_v1, %v1255_v4  ;;  %v1542_v13 = vsel %vm1478_vm1, %v1510_v3, %v1286_v5  ;;  %v1543_v6 = vsel %vm1479_vm2, %v1511_v2, %v1287_v28  ;;  %v332_v3 = vpop.permute.xlu0 %331 }
  0xf0   :  { %1574 = vst [vmem:[#allocation2 + $0x20] sm:$0xff] %v1382_v0  ;;  %1575 = vst [vmem:[#allocation2 + $0x28] sm:$0xff] %v1383_v7  ;;  %v520_v45 = vmul.f32 0.25, %v1656_v61  ;;  %v521_v59 = vmul.f32 0.25, %v1657_v35  ;;  %v1660_v8 = vround.rtne.f32 %v460_v32  ;;  %v1661_v27 = vround.rtne.f32 %v461_v14 }
  0xf1   :  { %1606 = vst [vmem:[#allocation2 + $0x30] sm:$0xff] %v1542_v13  ;;  %1607 = vst [vmem:[#allocation2 + $0x38] sm:$0xff] %v1543_v6  ;;  %v2268_v49 = vand.u32 3, %v1698_v26  ;;  %v2270_v11 = vand.u32 3, %v1701_v23  ;;  %v1710_v12 = vcvt.f32.s32 %v460_v32  ;;  %v1713_v60 = vcvt.f32.s32 %v461_v14  ;;  %v320_v32 = vpop.permute.xlu1 %319 }
  0xf2   :  { %v552_v37 = vsub.f32 %v2152_v20, %v520_v45  ;;  %v553_v48 = vsub.f32 %v2154_v24, %v521_v59  ;;  %v524_v42 = vmul.f32 0.25, %v1660_v8  ;;  %v525_v9 = vmul.f32 0.25, %v1661_v27 }
  0xf3   :  { %v1192_v24 = vand.u32 1, %v2268_v49  ;;  %v1193_v34 = vand.u32 1, %v2270_v11  ;;  %v2288_v4 = vand.u32 3, %v1710_v12  ;;  %v2290_v5 = vand.u32 3, %v1713_v60 }
  0xf4   :  { %v2272_v10 = vmul.f32 6.2831855, %v552_v37  ;;  %v2274_v58 = vmul.f32 6.2831855, %v553_v48  ;;  %v556_v14 = vsub.f32 %v2159_v29, %v524_v42  ;;  %v557_v44 = vsub.f32 %v2168_v38, %v525_v9 }
  0xf5   :  { %v394_v29 = vmul.f32 %v2048_v50, %v320_v32  ;;  %v395_v0 = vmul.f32 %v2050_v55, %v320_v32  ;;  %v400_v45 = vmul.f32 %v2048_v50, %v332_v3  ;;  %v1196_v37 = vand.u32 1, %v2288_v4 }
  0xf6   :  { %v2278_v31 = vmul.f32 %v2272_v10, %v2272_v10  ;;  %v2282_v20 = vmul.f32 %v2274_v58, %v2274_v58  ;;  %v2296_v61 = vmul.f32 6.2831855, %v556_v14  ;;  %v2298_v35 = vmul.f32 6.2831855, %v557_v44 }
  0xf7   :  { %v2320_v44 = vadd.f32 %v394_v29, %v1978_v16  ;;  %vm2322_vm4 = vcmp.eq.s32.totalorder %v1192_v24, 1  ;;  %vm1416_vm5 = vcmp.eq.s32.totalorder %v2268_v49, 1  ;;  %vm1448_vm6 = vcmp.eq.s32.totalorder %v2268_v49, 2 }
  0xf8   :  { %v648_v28 = vmul.f32 -0.0001984127, %v2278_v31  ;;  %v649_v54 = vmul.f32 -0.0001984127, %v2282_v20  ;;  %v872_v1 = vmul.f32 2.4801588e-05, %v2278_v31  ;;  %v2304_v13 = vmul.f32 %v2296_v61, %v2296_v61  ;;  %vm1480_vm12 = vmor %vm1416_vm5, %vm1448_vm6 }
  0xf9   :  { %v873_v2 = vmul.f32 2.4801588e-05, %v2282_v20  ;;  %v2308_v6 = vmul.f32 %v2298_v35, %v2298_v35  ;;  %vm2334_vm7 = vcmp.eq.s32.totalorder %v1193_v34, 1  ;;  %vm1417_vm8 = vcmp.eq.s32.totalorder %v2270_v11, 1 }
  0xfa   :  { %v680_v38 = vadd.f32 0.008333334, %v648_v28  ;;  %v681_v26 = vadd.f32 0.008333334, %v649_v54  ;;  %v904_v23 = vadd.f32 -0.0013888889, %v872_v1 }
  0xfb   :  { %v905_v7 = vadd.f32 -0.0013888889, %v873_v2  ;;  %v652_v12 = vmul.f32 -0.0001984127, %v2304_v13  ;;  %v653_v60 = vmul.f32 -0.0001984127, %v2308_v6 }
  0xfc   :  { %v712_v59 = vmul.f32 %v680_v38, %v2278_v31  ;;  %v713_v8 = vmul.f32 %v681_v26, %v2282_v20  ;;  %v936_v27 = vmul.f32 %v904_v23, %v2278_v31  ;;  %v876_v42 = vmul.f32 2.4801588e-05, %v2304_v13 }
  0xfd   :  { %v937_v48 = vmul.f32 %v905_v7, %v2282_v20  ;;  %v684_v1 = vadd.f32 0.008333334, %v652_v12  ;;  %v685_v2 = vadd.f32 0.008333334, %v653_v60  ;;  %v2329_v38 = vadd.f32 %v395_v0, %v1980_v17 }
  0xfe   :  { %v744_v9 = vadd.f32 -0.16666667, %v712_v59  ;;  %v745_v32 = vadd.f32 -0.16666667, %v713_v8  ;;  %v968_v14 = vadd.f32 0.041666668, %v936_v27 }
  0xff   :  { %v969_v28 = vadd.f32 0.041666668, %v937_v48  ;;  %vm1449_vm9 = vcmp.eq.s32.totalorder %v2270_v11, 2  ;;  %v877_v29 = vmul.f32 2.4801588e-05, %v2308_v6  ;;  %v716_v17 = vmul.f32 %v684_v1, %v2304_v13 }
 0x100   :  { %v776_v26 = vmul.f32 %v744_v9, %v2278_v31  ;;  %v777_v23 = vmul.f32 %v745_v32, %v2282_v20  ;;  %v1000_v16 = vmul.f32 %v968_v14, %v2278_v31  ;;  %v717_v0 = vmul.f32 %v685_v2, %v2308_v6  ;;  %vm1481_vm15 = vmor %vm1417_vm8, %vm1449_vm9 }
 0x101   :  { %v1001_v7 = vmul.f32 %v969_v28, %v2282_v20  ;;  %v908_v59 = vadd.f32 -0.0013888889, %v876_v42  ;;  %vm1320_vm10 = vcmp.ge.s32.totalorder %v2268_v49, 2  ;;  %v909_v34 = vadd.f32 -0.0013888889, %v877_v29 }
 0x102   :  { %v808_v8 = vadd.f32 1.0, %v776_v26  ;;  %v809_v27 = vadd.f32 1.0, %v777_v23  ;;  %v1032_v48 = vadd.f32 -0.5, %v1000_v16  ;;  %vm1321_vm11 = vcmp.ge.s32.totalorder %v2270_v11, 2 }
 0x103   :  { %v1033_v12 = vadd.f32 -0.5, %v1001_v7  ;;  %v748_v60 = vadd.f32 -0.16666667, %v716_v17  ;;  %v749_v9 = vadd.f32 -0.16666667, %v717_v0  ;;  %v940_v32 = vmul.f32 %v908_v59, %v2304_v13 }
 0x104   :  { %v1064_v14 = vmul.f32 %v1032_v48, %v2278_v31  ;;  %v941_v28 = vmul.f32 %v909_v34, %v2308_v6  ;;  %v1197_v1 = vand.u32 1, %v2290_v5  ;;  %v401_v42 = vmul.f32 %v2050_v55, %v332_v3 }
 0x105   :  { %v1065_v2 = vmul.f32 %v1033_v12, %v2282_v20  ;;  %v780_v26 = vmul.f32 %v748_v60, %v2304_v13  ;;  %v781_v23 = vmul.f32 %v749_v9, %v2308_v6  ;;  %v972_v16 = vadd.f32 0.041666668, %v940_v32 }
 0x106   :  { %v840_v29 = vmul.f32 %v808_v8, %v2272_v10  ;;  %v1096_v7 = vadd.f32 1.0, %v1064_v14  ;;  %v973_v17 = vadd.f32 0.041666668, %v941_v28  ;;  %v2356_v0 = vadd.f32 %v400_v45, %v2000_v57 }
 0x107   :  { %v841_v31 = vmul.f32 %v809_v27, %v2274_v58  ;;  %v1097_v59 = vadd.f32 1.0, %v1065_v2  ;;  %v812_v48 = vadd.f32 1.0, %v780_v26  ;;  %v1004_v3 = vmul.f32 %v972_v16, %v2304_v13 }
 0x108   :  { %v1256_v20 = vsel %vm2322_vm4, %v1096_v7, %v840_v29  ;;  %v1288_v34 = vsel %vm2322_vm4, %v840_v29, %v1096_v7  ;;  %v813_v12 = vadd.f32 1.0, %v781_v23  ;;  %v1005_v10 = vmul.f32 %v973_v17, %v2308_v6 }
 0x109   :  { %v1257_v8 = vsel %vm2334_vm7, %v1097_v59, %v841_v31  ;;  %v1289_v57 = vsel %vm2334_vm7, %v841_v31, %v1097_v59  ;;  %v1352_v58 = vsub.f32 0.0, %v1256_v20  ;;  %v1512_v45 = vsub.f32 0.0, %v1288_v34 }
 0x10a   :  { %v1353_v27 = vsub.f32 0.0, %v1257_v8  ;;  %v1513_v60 = vsub.f32 0.0, %v1289_v57  ;;  %vm2375_vm13 = vcmp.eq.s32.totalorder %v1196_v37, 1  ;;  %vm2379_vm14 = vcmp.eq.s32.totalorder %v1197_v1, 1 }
 0x10b   :  { %v1384_v24 = vsel %vm1320_vm10, %v1352_v58, %v1256_v20  ;;  %v1544_v32 = vsel %vm1480_vm12, %v1512_v45, %v1288_v34  ;;  %v1036_v14 = vadd.f32 -0.5, %v1004_v3  ;;  %v1037_v28 = vadd.f32 -0.5, %v1005_v10 }
 0x10c   :  { %v1385_v37 = vsel %vm1321_vm11, %v1353_v27, %v1257_v8  ;;  %v1545_v2 = vsel %vm1481_vm15, %v1513_v60, %v1289_v57  ;;  %1576 = vst [vmem:[#allocation2 + $0x40] sm:$0xff] %v1384_v24  ;;  %1608 = vst [vmem:[#allocation2 + $0x50] sm:$0xff] %v1544_v32  ;;  %v844_v1 = vmul.f32 %v812_v48, %v2296_v61  ;;  %vm1324_vm0 = vcmp.ge.s32.totalorder %v2288_v4, 2 }
 0x10d   :  { %1577 = vst [vmem:[#allocation2 + $0x48] sm:$0xff] %v1385_v37  ;;  %1609 = vst [vmem:[#allocation2 + $0x58] sm:$0xff] %v1545_v2  ;;  %v845_v49 = vmul.f32 %v813_v12, %v2298_v35  ;;  %v1068_v26 = vmul.f32 %v1036_v14, %v2304_v13  ;;  %v1069_v23 = vmul.f32 %v1037_v28, %v2308_v6  ;;  %vm1325_vm3 = vcmp.ge.s32.totalorder %v2290_v5, 2  ;;  %v328_v28 = vpop.permute.xlu1 %327 }
 0x10e   :  { %vm1420_vm1 = vcmp.eq.s32.totalorder %v2288_v4, 1  ;;  %vm1421_vm2 = vcmp.eq.s32.totalorder %v2290_v5, 1  ;;  %v458_v11 = vmul.f32 4.0, %v2320_v44  ;;  %v459_v61 = vmul.f32 4.0, %v2329_v38 }
 0x10f   :  { %v1100_v16 = vadd.f32 1.0, %v1068_v26  ;;  %v1101_v29 = vadd.f32 1.0, %v1069_v23  ;;  %vm1452_vm4 = vcmp.eq.s32.totalorder %v2288_v4, 2  ;;  %vm1453_vm5 = vcmp.eq.s32.totalorder %v2290_v5, 2 }
 0x110   :  { %v1658_v35 = vround.rtne.f32 %v458_v11  ;;  %v1659_v13 = vround.rtne.f32 %v459_v61  ;;  %v1704_v7 = vcvt.f32.s32 %v458_v11  ;;  %v433_v6 = vadd.f32 %v401_v42, %v2002_v62  ;;  %vm1484_vm6 = vmor %vm1420_vm1, %vm1452_vm4 }
 0x111   :  { %v1260_v17 = vsel %vm2375_vm13, %v1100_v16, %v844_v1  ;;  %v1261_v31 = vsel %vm2379_vm14, %v1101_v29, %v845_v49  ;;  %v1292_v59 = vsel %vm2375_vm13, %v844_v1, %v1100_v16  ;;  %v1293_v48 = vsel %vm2379_vm14, %v845_v49, %v1101_v29  ;;  %vm1485_vm7 = vmor %vm1421_vm2, %vm1453_vm5 }
 0x112   :  { %v1356_v3 = vsub.f32 0.0, %v1260_v17  ;;  %v1357_v20 = vsub.f32 0.0, %v1261_v31  ;;  %v1516_v34 = vsub.f32 0.0, %v1292_v59  ;;  %v1517_v12 = vsub.f32 0.0, %v1293_v48 }
 0x113   :  { %v522_v62 = vmul.f32 0.25, %v1658_v35  ;;  %v523_v42 = vmul.f32 0.25, %v1659_v13  ;;  %v1707_v10 = vcvt.f32.s32 %v459_v61  ;;  %v2417_v8 = vmul.f32 4.0, %v2356_v0 }
 0x114   :  { %v1388_v57 = vsel %vm1324_vm0, %v1356_v3, %v1260_v17  ;;  %v1389_v58 = vsel %vm1325_vm3, %v1357_v20, %v1261_v31  ;;  %v1548_v45 = vsel %vm1484_vm6, %v1516_v34, %v1292_v59  ;;  %v1549_v27 = vsel %vm1485_vm7, %v1517_v12, %v1293_v48 }
 0x115   :  { %1580 = vst [vmem:[#allocation2 + $0x80] sm:$0xff] %v1388_v57  ;;  %1581 = vst [vmem:[#allocation2 + $0x88] sm:$0xff] %v1389_v58  ;;  %v554_v60 = vsub.f32 %v2320_v44, %v522_v62  ;;  %v555_v54 = vsub.f32 %v2329_v38, %v523_v42  ;;  %v2425_v9 = vand.u32 3, %v1704_v7  ;;  %v2431_v4 = vand.u32 3, %v1707_v10 }
 0x116   :  { %1612 = vst [vmem:[#allocation2 + $0x90] sm:$0xff] %v1548_v45  ;;  %1613 = vst [vmem:[#allocation2 + $0x98] sm:$0xff] %v1549_v27  ;;  %v2433_v5 = vmul.f32 4.0, %v433_v6  ;;  %v1664_v14 = vround.rtne.f32 %v2417_v8  ;;  %v398_v11 = vmul.f32 %v2048_v50, %v328_v28  ;;  %v399_v31 = vmul.f32 %v2050_v55, %v328_v28 }
 0x117   :  { %v2427_v24 = vmul.f32 6.2831855, %v554_v60  ;;  %v2429_v32 = vmul.f32 6.2831855, %v555_v54  ;;  %v1194_v38 = vand.u32 1, %v2425_v9  ;;  %v1195_v16 = vand.u32 1, %v2431_v4 }
 0x118   :  { %v1665_v2 = vround.rtne.f32 %v2433_v5  ;;  %v528_v1 = vmul.f32 0.25, %v1664_v14  ;;  %v1722_v20 = vcvt.f32.s32 %v2417_v8  ;;  %v1725_v42 = vcvt.f32.s32 %v2433_v5 }
 0x119   :  { %v618_v37 = vmul.f32 %v2427_v24, %v2427_v24  ;;  %v2440_v44 = vmul.f32 %v2429_v32, %v2429_v32  ;;  %v2466_v27 = vadd.f32 %v399_v31, %v1994_v39  ;;  %vm2468_vm8 = vcmp.eq.s32.totalorder %v1194_v38, 1 }
 0x11a   :  { %v529_v29 = vmul.f32 0.25, %v1665_v2  ;;  %v560_v35 = vsub.f32 %v2356_v0, %v528_v1  ;;  %vm1418_vm9 = vcmp.eq.s32.totalorder %v2425_v9, 1  ;;  %vm1450_vm10 = vcmp.eq.s32.totalorder %v2425_v9, 2 }
 0x11b   :  { %v650_v49 = vmul.f32 -0.0001984127, %v618_v37  ;;  %v651_v26 = vmul.f32 -0.0001984127, %v2440_v44  ;;  %v874_v23 = vmul.f32 2.4801588e-05, %v618_v37  ;;  %vm1482_vm0 = vmor %vm1418_vm9, %vm1450_vm10 }
 0x11c   :  { %v875_v61 = vmul.f32 2.4801588e-05, %v2440_v44  ;;  %v561_v48 = vsub.f32 %v433_v6, %v529_v29  ;;  %v2450_v3 = vmul.f32 6.2831855, %v560_v35  ;;  %v2463_v6 = vadd.f32 %v398_v11, %v1992_v33 }
 0x11d   :  { %v682_v13 = vadd.f32 0.008333334, %v650_v49  ;;  %v683_v7 = vadd.f32 0.008333334, %v651_v26  ;;  %v906_v17 = vadd.f32 -0.0013888889, %v874_v23 }
 0x11e   :  { %v907_v59 = vadd.f32 -0.0013888889, %v875_v61  ;;  %v2456_v0 = vmul.f32 6.2831855, %v561_v48  ;;  %v2460_v57 = vmul.f32 %v2450_v3, %v2450_v3  ;;  %vm2481_vm11 = vcmp.eq.s32.totalorder %v1195_v16, 1 }
 0x11f   :  { %v714_v34 = vmul.f32 %v682_v13, %v618_v37  ;;  %v715_v12 = vmul.f32 %v683_v7, %v2440_v44  ;;  %v938_v62 = vmul.f32 %v906_v17, %v618_v37  ;;  %vm1419_vm12 = vcmp.eq.s32.totalorder %v2431_v4, 1 }
 0x120   :  { %v939_v10 = vmul.f32 %v907_v59, %v2440_v44  ;;  %v2476_v5 = vmul.f32 %v2456_v0, %v2456_v0  ;;  %v656_v33 = vmul.f32 -0.0001984127, %v2460_v57  ;;  %v880_v14 = vmul.f32 2.4801588e-05, %v2460_v57 }
 0x121   :  { %v746_v58 = vadd.f32 -0.16666667, %v714_v34  ;;  %v747_v45 = vadd.f32 -0.16666667, %v715_v12  ;;  %v970_v8 = vadd.f32 0.041666668, %v938_v62 }
 0x122   :  { %v971_v60 = vadd.f32 0.041666668, %v939_v10  ;;  %vm1451_vm13 = vcmp.eq.s32.totalorder %v2431_v4, 2  ;;  %v2487_v1 = vand.u32 3, %v1722_v20  ;;  %v657_v26 = vmul.f32 -0.0001984127, %v2476_v5 }
 0x123   :  { %v778_v28 = vmul.f32 %v746_v58, %v618_v37  ;;  %v779_v39 = vmul.f32 %v747_v45, %v2440_v44  ;;  %v1002_v2 = vmul.f32 %v970_v8, %v618_v37  ;;  %v688_v23 = vadd.f32 0.008333334, %v656_v33  ;;  %vm1483_vm3 = vmor %vm1419_vm12, %vm1451_vm13 }
 0x124   :  { %v1003_v49 = vmul.f32 %v971_v60, %v2440_v44  ;;  %v881_v11 = vmul.f32 2.4801588e-05, %v2476_v5  ;;  %vm1322_vm14 = vcmp.ge.s32.totalorder %v2425_v9, 2  ;;  %v912_v16 = vadd.f32 -0.0013888889, %v880_v14 }
 0x125   :  { %v810_v61 = vadd.f32 1.0, %v778_v28  ;;  %v811_v29 = vadd.f32 1.0, %v779_v39  ;;  %v1034_v35 = vadd.f32 -0.5, %v1002_v2  ;;  %vm1323_vm15 = vcmp.ge.s32.totalorder %v2431_v4, 2 }
 0x126   :  { %v1035_v13 = vadd.f32 -0.5, %v1003_v49  ;;  %v689_v7 = vadd.f32 0.008333334, %v657_v26  ;;  %v720_v17 = vmul.f32 %v688_v23, %v2460_v57  ;;  %v913_v31 = vadd.f32 -0.0013888889, %v881_v11  ;;  %v340_v11 = vpop.permute.xlu0 %339 }
 0x127   :  { %v1066_v59 = vmul.f32 %v1034_v35, %v618_v37  ;;  %v944_v48 = vmul.f32 %v912_v16, %v2460_v57  ;;  %v2496_v20 = vand.u32 3, %v1725_v42  ;;  %v1200_v34 = vand.u32 1, %v2487_v1 }
 0x128   :  { %v1067_v12 = vmul.f32 %v1035_v13, %v2440_v44  ;;  %v721_v62 = vmul.f32 %v689_v7, %v2476_v5  ;;  %v752_v10 = vadd.f32 -0.16666667, %v720_v17  ;;  %v945_v58 = vmul.f32 %v913_v31, %v2476_v5 }
 0x129   :  { %v842_v45 = vmul.f32 %v810_v61, %v2427_v24  ;;  %v843_v8 = vmul.f32 %v811_v29, %v2429_v32  ;;  %v1098_v60 = vadd.f32 1.0, %v1066_v59  ;;  %v976_v33 = vadd.f32 0.041666668, %v944_v48 }
 0x12a   :  { %v1099_v37 = vadd.f32 1.0, %v1067_v12  ;;  %v753_v14 = vadd.f32 -0.16666667, %v721_v62  ;;  %v784_v42 = vmul.f32 %v752_v10, %v2460_v57  ;;  %v977_v28 = vadd.f32 0.041666668, %v945_v58 }
 0x12b   :  { %v1258_v39 = vsel %vm2468_vm8, %v1098_v60, %v842_v45  ;;  %v1290_v44 = vsel %vm2468_vm8, %v842_v45, %v1098_v60  ;;  %v1008_v2 = vmul.f32 %v976_v33, %v2460_v57  ;;  %v1201_v49 = vand.u32 1, %v2496_v20 }
 0x12c   :  { %v1259_v24 = vsel %vm2481_vm11, %v1099_v37, %v843_v8  ;;  %v1291_v32 = vsel %vm2481_vm11, %v843_v8, %v1099_v37  ;;  %v1354_v26 = vsub.f32 0.0, %v1258_v39  ;;  %v1514_v23 = vsub.f32 0.0, %v1290_v44 }
 0x12d   :  { %v1355_v61 = vsub.f32 0.0, %v1259_v24  ;;  %v1515_v54 = vsub.f32 0.0, %v1291_v32  ;;  %v785_v29 = vmul.f32 %v753_v14, %v2476_v5  ;;  %v816_v35 = vadd.f32 1.0, %v784_v42 }
 0x12e   :  { %v1386_v16 = vsel %vm1322_vm14, %v1354_v26, %v1258_v39  ;;  %v1546_v38 = vsel %vm1482_vm0, %v1514_v23, %v1290_v44  ;;  %v1009_v13 = vmul.f32 %v977_v28, %v2476_v5  ;;  %v1040_v7 = vadd.f32 -0.5, %v1008_v2 }
 0x12f   :  { %v1387_v17 = vsel %vm1323_vm15, %v1355_v61, %v1259_v24  ;;  %v1547_v31 = vsel %vm1483_vm3, %v1515_v54, %v1291_v32  ;;  %1578 = vst [vmem:[#allocation2 + $0x60] sm:$0xff] %v1386_v16  ;;  %1610 = vst [vmem:[#allocation2 + $0x70] sm:$0xff] %v1546_v38  ;;  %v817_v59 = vadd.f32 1.0, %v785_v29  ;;  %v404_v48 = vmul.f32 %v2048_v50, %v340_v11 }
 0x130   :  { %1579 = vst [vmem:[#allocation2 + $0x68] sm:$0xff] %v1387_v17  ;;  %1611 = vst [vmem:[#allocation2 + $0x78] sm:$0xff] %v1547_v31  ;;  %v1041_v9 = vadd.f32 -0.5, %v1009_v13  ;;  %v1072_v12 = vmul.f32 %v1040_v7, %v2460_v57  ;;  %vm2531_vm1 = vcmp.eq.s32.totalorder %v1200_v34, 1  ;;  %v405_v10 = vmul.f32 %v2050_v55, %v340_v11 }
 0x131   :  { %v848_v4 = vmul.f32 %v816_v35, %v2450_v3  ;;  %vm2537_vm2 = vcmp.eq.s32.totalorder %v1201_v49, 1  ;;  %vm1328_vm4 = vcmp.ge.s32.totalorder %v2487_v1, 2  ;;  %v462_v45 = vmul.f32 4.0, %v2463_v6 }
 0x132   :  { %v1073_v8 = vmul.f32 %v1041_v9, %v2476_v5  ;;  %v1104_v60 = vadd.f32 1.0, %v1072_v12  ;;  %vm1424_vm5 = vcmp.eq.s32.totalorder %v2487_v1, 1  ;;  %v463_v57 = vmul.f32 4.0, %v2466_v27 }
 0x133   :  { %v849_v34 = vmul.f32 %v817_v59, %v2456_v0  ;;  %vm1425_vm6 = vcmp.eq.s32.totalorder %v2496_v20, 1  ;;  %vm1456_vm7 = vcmp.eq.s32.totalorder %v2487_v1, 2  ;;  %v1662_v3 = vround.rtne.f32 %v462_v45 }
 0x134   :  { %v1105_v33 = vadd.f32 1.0, %v1073_v8  ;;  %v1264_v37 = vsel %vm2531_vm1, %v1104_v60, %v848_v4  ;;  %v1296_v14 = vsel %vm2531_vm1, %v848_v4, %v1104_v60  ;;  %v1663_v5 = vround.rtne.f32 %v463_v57  ;;  %vm1488_vm9 = vmor %vm1424_vm5, %vm1456_vm7 }
 0x135   :  { %v1360_v42 = vsub.f32 0.0, %v1264_v37  ;;  %vm1457_vm8 = vcmp.eq.s32.totalorder %v2496_v20, 2  ;;  %v1520_v28 = vsub.f32 0.0, %v1296_v14  ;;  %v526_v39 = vmul.f32 0.25, %v1662_v3 }
 0x136   :  { %v1265_v0 = vsel %vm2537_vm2, %v1105_v33, %v849_v34  ;;  %v1297_v44 = vsel %vm2537_vm2, %v849_v34, %v1105_v33  ;;  %v527_v2 = vmul.f32 0.25, %v1663_v5  ;;  %v1716_v49 = vcvt.f32.s32 %v462_v45  ;;  %vm1489_vm11 = vmor %vm1425_vm6, %vm1457_vm8  ;;  %v2588_v33 = vpop.permute.xlu0 %347 }
 0x137   :  { %v1361_v24 = vsub.f32 0.0, %v1265_v0  ;;  %v1392_v32 = vsel %vm1328_vm4, %v1360_v42, %v1264_v37  ;;  %v1521_v26 = vsub.f32 0.0, %v1297_v44  ;;  %v1552_v23 = vsel %vm1488_vm9, %v1520_v28, %v1296_v14 }
 0x138   :  { %vm1329_vm10 = vcmp.ge.s32.totalorder %v2496_v20, 2  ;;  %1584 = vst [vmem:[#allocation2 + $0xc0] sm:$0xff] %v1392_v32  ;;  %1616 = vst [vmem:[#allocation2 + $0xd0] sm:$0xff] %v1552_v23  ;;  %v558_v11 = vsub.f32 %v2463_v6, %v526_v39  ;;  %v559_v61 = vsub.f32 %v2466_v27, %v527_v2  ;;  %v436_v54 = vadd.f32 %v404_v48, %v2015_v43 }
 0x139   :  { %v1393_v29 = vsel %vm1329_vm10, %v1361_v24, %v1265_v0  ;;  %v1553_v35 = vsel %vm1489_vm11, %v1521_v26, %v1297_v44  ;;  %v1719_v16 = vcvt.f32.s32 %v463_v57  ;;  %v437_v1 = vadd.f32 %v405_v10, %v2018_v40  ;;  %v336_v40 = vpop.permute.xlu1 %335 }
 0x13a   :  { %1585 = vst [vmem:[#allocation2 + $0xc8] sm:$0xff] %v1393_v29  ;;  %1617 = vst [vmem:[#allocation2 + $0xd8] sm:$0xff] %v1553_v35  ;;  %v2569_v38 = vmul.f32 6.2831855, %v558_v11  ;;  %v2571_v13 = vmul.f32 6.2831855, %v559_v61  ;;  %v402_v8 = vmul.f32 %v2048_v50, %v336_v40  ;;  %v403_v44 = vmul.f32 %v2050_v55, %v336_v40 }
 0x13b   :  { %v2573_v20 = vand.u32 3, %v1716_v49  ;;  %v468_v43 = vmul.f32 4.0, %v436_v54  ;;  %v2581_v7 = vand.u32 3, %v1719_v16  ;;  %v469_v17 = vmul.f32 4.0, %v437_v1 }
 0x13c   :  { %v622_v6 = vmul.f32 %v2569_v38, %v2569_v38  ;;  %v2579_v27 = vmul.f32 %v2571_v13, %v2571_v13  ;;  %v408_v32 = vmul.f32 %v2048_v50, %v2588_v33 }
 0x13d   :  { %v1668_v9 = vround.rtne.f32 %v468_v43  ;;  %v1198_v62 = vand.u32 1, %v2573_v20  ;;  %v1669_v10 = vround.rtne.f32 %v469_v17  ;;  %v1199_v57 = vand.u32 1, %v2581_v7 }
 0x13e   :  { %v654_v31 = vmul.f32 -0.0001984127, %v622_v6  ;;  %v655_v59 = vmul.f32 -0.0001984127, %v2579_v27  ;;  %v878_v48 = vmul.f32 2.4801588e-05, %v622_v6  ;;  %v1734_v42 = vcvt.f32.s32 %v468_v43 }
 0x13f   :  { %v879_v12 = vmul.f32 2.4801588e-05, %v2579_v27  ;;  %v532_v34 = vmul.f32 0.25, %v1668_v9  ;;  %v533_v3 = vmul.f32 0.25, %v1669_v10  ;;  %vm2595_vm12 = vcmp.eq.s32.totalorder %v1198_v62, 1 }
 0x140   :  { %v686_v4 = vadd.f32 0.008333334, %v654_v31  ;;  %v687_v58 = vadd.f32 0.008333334, %v655_v59  ;;  %v910_v45 = vadd.f32 -0.0013888889, %v878_v48  ;;  %v2624_v59 = vadd.f32 %v402_v8, %v2004_v63 }
 0x141   :  { %v911_v60 = vadd.f32 -0.0013888889, %v879_v12  ;;  %v564_v39 = vsub.f32 %v436_v54, %v532_v34  ;;  %v565_v0 = vsub.f32 %v437_v1, %v533_v3  ;;  %vm1422_vm13 = vcmp.eq.s32.totalorder %v2573_v20, 1 }
 0x142   :  { %v718_v37 = vmul.f32 %v686_v4, %v622_v6  ;;  %v719_v14 = vmul.f32 %v687_v58, %v2579_v27  ;;  %v942_v5 = vmul.f32 %v910_v45, %v622_v6  ;;  %vm1454_vm14 = vcmp.eq.s32.totalorder %v2573_v20, 2 }
 0x143   :  { %v943_v28 = vmul.f32 %v911_v60, %v2579_v27  ;;  %v2601_v11 = vmul.f32 6.2831855, %v564_v39  ;;  %v2603_v61 = vmul.f32 6.2831855, %v565_v0  ;;  %v1737_v54 = vcvt.f32.s32 %v469_v17  ;;  %vm1486_vm4 = vmor %vm1422_vm13, %vm1454_vm14 }
 0x144   :  { %v750_v2 = vadd.f32 -0.16666667, %v718_v37  ;;  %v751_v49 = vadd.f32 -0.16666667, %v719_v14  ;;  %v974_v24 = vadd.f32 0.041666668, %v942_v5  ;;  %v2628_v62 = vadd.f32 %v403_v44, %v2006_v36 }
 0x145   :  { %v975_v26 = vadd.f32 0.041666668, %v943_v28  ;;  %vm2606_vm15 = vcmp.eq.s32.totalorder %v1199_v57, 1  ;;  %vm1423_vm0 = vcmp.eq.s32.totalorder %v2581_v7, 1  ;;  %vm1455_vm3 = vcmp.eq.s32.totalorder %v2581_v7, 2 }
 0x146   :  { %v782_v29 = vmul.f32 %v750_v2, %v622_v6  ;;  %v783_v35 = vmul.f32 %v751_v49, %v2579_v27  ;;  %v1006_v16 = vmul.f32 %v974_v24, %v622_v6  ;;  %v2612_v43 = vand.u32 3, %v1734_v42  ;;  %vm1487_vm5 = vmor %vm1423_vm0, %vm1455_vm3 }
 0x147   :  { %v1007_v40 = vmul.f32 %v975_v26, %v2579_v27  ;;  %v2617_v31 = vmul.f32 %v2601_v11, %v2601_v11  ;;  %v2621_v17 = vmul.f32 %v2603_v61, %v2603_v61  ;;  %vm1326_vm1 = vcmp.ge.s32.totalorder %v2573_v20, 2 }
 0x148   :  { %v814_v48 = vadd.f32 1.0, %v782_v29  ;;  %v815_v9 = vadd.f32 1.0, %v783_v35  ;;  %v1038_v12 = vadd.f32 -0.5, %v1006_v16  ;;  %vm1327_vm2 = vcmp.ge.s32.totalorder %v2581_v7, 2 }
 0x149   :  { %v1039_v10 = vadd.f32 -0.5, %v1007_v40  ;;  %v660_v4 = vmul.f32 -0.0001984127, %v2617_v31  ;;  %v661_v58 = vmul.f32 -0.0001984127, %v2621_v17  ;;  %v2633_v45 = vand.u32 3, %v1737_v54 }
 0x14a   :  { %v1070_v60 = vmul.f32 %v1038_v12, %v622_v6  ;;  %v884_v63 = vmul.f32 2.4801588e-05, %v2617_v31  ;;  %v1204_v8 = vand.u32 1, %v2612_v43  ;;  %v2638_v57 = vadd.f32 %v408_v32, %v2033_v46 }
 0x14b   :  { %v1071_v36 = vmul.f32 %v1039_v10, %v2579_v27  ;;  %v692_v34 = vadd.f32 0.008333334, %v660_v4  ;;  %v693_v3 = vadd.f32 0.008333334, %v661_v58  ;;  %v885_v37 = vmul.f32 2.4801588e-05, %v2621_v17 }
 0x14c   :  { %v846_v14 = vmul.f32 %v814_v48, %v2569_v38  ;;  %v847_v5 = vmul.f32 %v815_v9, %v2571_v13  ;;  %v1102_v42 = vadd.f32 1.0, %v1070_v60  ;;  %v916_v28 = vadd.f32 -0.0013888889, %v884_v63 }
 0x14d   :  { %v1103_v6 = vadd.f32 1.0, %v1071_v36  ;;  %v724_v39 = vmul.f32 %v692_v34, %v2617_v31  ;;  %v725_v0 = vmul.f32 %v693_v3, %v2621_v17  ;;  %v917_v44 = vadd.f32 -0.0013888889, %v885_v37 }
 0x14e   :  { %v1262_v46 = vsel %vm2595_vm12, %v1102_v42, %v846_v14  ;;  %v1294_v27 = vsel %vm2595_vm12, %v846_v14, %v1102_v42  ;;  %v948_v2 = vmul.f32 %v916_v28, %v2617_v31  ;;  %v1205_v38 = vand.u32 1, %v2633_v45 }
 0x14f   :  { %v1263_v13 = vsel %vm2606_vm15, %v1103_v6, %v847_v5  ;;  %v1295_v49 = vsel %vm2606_vm15, %v847_v5, %v1103_v6  ;;  %v1358_v24 = vsub.f32 0.0, %v1262_v46  ;;  %v1518_v32 = vsub.f32 0.0, %v1294_v27 }
 0x150   :  { %v1359_v26 = vsub.f32 0.0, %v1263_v13  ;;  %v1519_v23 = vsub.f32 0.0, %v1295_v49  ;;  %v756_v54 = vadd.f32 -0.16666667, %v724_v39  ;;  %v757_v29 = vadd.f32 -0.16666667, %v725_v0 }
 0x151   :  { %v1390_v35 = vsel %vm1326_vm1, %v1358_v24, %v1262_v46  ;;  %v1550_v16 = vsel %vm1486_vm4, %v1518_v32, %v1294_v27  ;;  %v949_v1 = vmul.f32 %v917_v44, %v2621_v17  ;;  %v980_v40 = vadd.f32 0.041666668, %v948_v2 }
 0x152   :  { %v1391_v48 = vsel %vm1327_vm2, %v1359_v26, %v1263_v13  ;;  %v1551_v9 = vsel %vm1487_vm5, %v1519_v23, %v1295_v49  ;;  %1582 = vst [vmem:[#allocation2 + $0xa0] sm:$0xff] %v1390_v35  ;;  %1614 = vst [vmem:[#allocation2 + $0xb0] sm:$0xff] %v1550_v16  ;;  %v788_v12 = vmul.f32 %v756_v54, %v2617_v31  ;;  %vm2672_vm6 = vcmp.eq.s32.totalorder %v1204_v8, 1 }
 0x153   :  { %v789_v20 = vmul.f32 %v757_v29, %v2621_v17  ;;  %1583 = vst [vmem:[#allocation2 + $0xa8] sm:$0xff] %v1391_v48  ;;  %1615 = vst [vmem:[#allocation2 + $0xb8] sm:$0xff] %v1551_v9  ;;  %v981_v10 = vadd.f32 0.041666668, %v949_v1  ;;  %v1012_v4 = vmul.f32 %v980_v40, %v2617_v31  ;;  %v409_v7 = vmul.f32 %v2050_v55, %v2588_v33 }
 0x154   :  { %v820_v60 = vadd.f32 1.0, %v788_v12  ;;  %vm2678_vm7 = vcmp.eq.s32.totalorder %v1205_v38, 1  ;;  %v466_v36 = vmul.f32 4.0, %v2624_v59  ;;  %v467_v34 = vmul.f32 4.0, %v2628_v62 }
 0x155   :  { %v1013_v3 = vmul.f32 %v981_v10, %v2621_v17  ;;  %v1044_v37 = vadd.f32 -0.5, %v1012_v4  ;;  %vm1332_vm8 = vcmp.ge.s32.totalorder %v2612_v43, 2  ;;  %vm1428_vm9 = vcmp.eq.s32.totalorder %v2612_v43, 1 }
 0x156   :  { %v2688_v8 = vmul.f32 4.0, %v2638_v57  ;;  %v821_v33 = vadd.f32 1.0, %v789_v20  ;;  %vm1429_vm10 = vcmp.eq.s32.totalorder %v2633_v45, 1  ;;  %v1666_v14 = vround.rtne.f32 %v466_v36 }
 0x157   :  { %v1667_v5 = vround.rtne.f32 %v467_v34  ;;  %v1045_v42 = vadd.f32 -0.5, %v1013_v3  ;;  %v1076_v28 = vmul.f32 %v1044_v37, %v2617_v31  ;;  %vm1460_vm11 = vcmp.eq.s32.totalorder %v2612_v43, 2 }
 0x158   :  { %v2694_v6 = vadd.f32 %v409_v7, %v2036_v47  ;;  %v852_v39 = vmul.f32 %v820_v60, %v2601_v11  ;;  %vm1461_vm12 = vcmp.eq.s32.totalorder %v2633_v45, 2  ;;  %v530_v0 = vmul.f32 0.25, %v1666_v14  ;;  %vm1492_vm13 = vmor %vm1428_vm9, %vm1460_vm11 }
 0x159   :  { %v531_v44 = vmul.f32 0.25, %v1667_v5  ;;  %v1077_v46 = vmul.f32 %v1045_v42, %v2621_v17  ;;  %v1108_v27 = vadd.f32 1.0, %v1076_v28  ;;  %v1728_v2 = vcvt.f32.s32 %v466_v36  ;;  %vm1493_vm15 = vmor %vm1429_vm10, %vm1461_vm12 }
 0x15a   :  { %v1672_v38 = vround.rtne.f32 %v2688_v8  ;;  %v853_v13 = vmul.f32 %v821_v33, %v2603_v61  ;;  %v562_v31 = vsub.f32 %v2624_v59, %v530_v0  ;;  %v1731_v47 = vcvt.f32.s32 %v467_v34 }
 0x15b   :  { %v563_v49 = vsub.f32 %v2628_v62, %v531_v44  ;;  %v1109_v24 = vadd.f32 1.0, %v1077_v46  ;;  %v1268_v11 = vsel %vm2672_vm6, %v1108_v27, %v852_v39  ;;  %v1300_v32 = vsel %vm2672_vm6, %v852_v39, %v1108_v27 }
 0x15c   :  { %v2708_v17 = vmul.f32 4.0, %v2694_v6  ;;  %v1364_v26 = vsub.f32 0.0, %v1268_v11  ;;  %v1524_v23 = vsub.f32 0.0, %v1300_v32  ;;  %v2710_v54 = vmul.f32 6.2831855, %v562_v31 }
 0x15d   :  { %v2712_v61 = vmul.f32 6.2831855, %v563_v49  ;;  %v1269_v59 = vsel %vm2678_vm7, %v1109_v24, %v853_v13  ;;  %v1301_v62 = vsel %vm2678_vm7, %v853_v13, %v1109_v24  ;;  %v2722_v29 = vand.u32 3, %v1728_v2 }
 0x15e   :  { %v536_v35 = vmul.f32 0.25, %v1672_v38  ;;  %v1365_v16 = vsub.f32 0.0, %v1269_v59  ;;  %v1396_v1 = vsel %vm1332_vm8, %v1364_v26, %v1268_v11  ;;  %v1525_v40 = vsub.f32 0.0, %v1301_v62 }
 0x15f   :  { %v1556_v48 = vsel %vm1492_vm13, %v1524_v23, %v1300_v32  ;;  %vm1333_vm14 = vcmp.ge.s32.totalorder %v2633_v45, 2  ;;  %1588 = vst [vmem:[#allocation2 + $0x100] sm:$0xff] %v1396_v1  ;;  %v626_v9 = vmul.f32 %v2710_v54, %v2710_v54  ;;  %v2735_v12 = vmul.f32 %v2712_v61, %v2712_v61  ;;  %v344_v1 = vpop.permute.xlu1 %343 }
 0x160   :  { %1620 = vst [vmem:[#allocation2 + $0x110] sm:$0xff] %v1556_v48  ;;  %v1397_v43 = vsel %vm1333_vm14, %v1365_v16, %v1269_v59  ;;  %v1557_v20 = vsel %vm1493_vm15, %v1525_v40, %v1301_v62  ;;  %v2737_v10 = vand.u32 3, %v1731_v47  ;;  %v1673_v4 = vround.rtne.f32 %v2708_v17 }
 0x161   :  { %1589 = vst [vmem:[#allocation2 + $0x108] sm:$0xff] %v1397_v43  ;;  %1621 = vst [vmem:[#allocation2 + $0x118] sm:$0xff] %v1557_v20  ;;  %v658_v58 = vmul.f32 -0.0001984127, %v626_v9  ;;  %v659_v45 = vmul.f32 -0.0001984127, %v2735_v12  ;;  %v568_v60 = vsub.f32 %v2638_v57, %v536_v35  ;;  %v1746_v33 = vcvt.f32.s32 %v2688_v8 }
 0x162   :  { %v882_v7 = vmul.f32 2.4801588e-05, %v626_v9  ;;  %v883_v63 = vmul.f32 2.4801588e-05, %v2735_v12  ;;  %v1202_v36 = vand.u32 1, %v2722_v29  ;;  %v1203_v5 = vand.u32 1, %v2737_v10 }
 0x163   :  { %v690_v34 = vadd.f32 0.008333334, %v658_v58  ;;  %v691_v3 = vadd.f32 0.008333334, %v659_v45  ;;  %v537_v42 = vmul.f32 0.25, %v1673_v4  ;;  %v1749_v57 = vcvt.f32.s32 %v2708_v17 }
 0x164   :  { %v914_v37 = vadd.f32 -0.0013888889, %v882_v7  ;;  %v915_v14 = vadd.f32 -0.0013888889, %v883_v63  ;;  %v2746_v28 = vmul.f32 6.2831855, %v568_v60 }
 0x165   :  { %v722_v39 = vmul.f32 %v690_v34, %v626_v9  ;;  %v723_v0 = vmul.f32 %v691_v3, %v2735_v12  ;;  %v569_v27 = vsub.f32 %v2694_v6, %v537_v42  ;;  %v2756_v8 = vand.u32 3, %v1746_v33 }
 0x166   :  { %v946_v44 = vmul.f32 %v914_v37, %v626_v9  ;;  %v947_v46 = vmul.f32 %v915_v14, %v2735_v12  ;;  %v2754_v2 = vmul.f32 %v2746_v28, %v2746_v28  ;;  %vm2758_vm0 = vcmp.eq.s32.totalorder %v1202_v36, 1 }
 0x167   :  { %v754_v38 = vadd.f32 -0.16666667, %v722_v39  ;;  %v755_v13 = vadd.f32 -0.16666667, %v723_v0  ;;  %vm1426_vm3 = vcmp.eq.s32.totalorder %v2722_v29, 1  ;;  %vm1458_vm1 = vcmp.eq.s32.totalorder %v2722_v29, 2 }
 0x168   :  { %v978_v31 = vadd.f32 0.041666668, %v946_v44  ;;  %v979_v49 = vadd.f32 0.041666668, %v947_v46  ;;  %v2764_v24 = vmul.f32 6.2831855, %v569_v27  ;;  %v406_v34 = vmul.f32 %v2048_v50, %v344_v1  ;;  %vm1490_vm8 = vmor %vm1426_vm3, %vm1458_vm1 }
 0x169   :  { %v664_v6 = vmul.f32 -0.0001984127, %v2754_v2  ;;  %v786_v11 = vmul.f32 %v754_v38, %v626_v9  ;;  %v787_v32 = vmul.f32 %v755_v13, %v2735_v12  ;;  %vm2768_vm2 = vcmp.eq.s32.totalorder %v1203_v5, 1 }
 0x16a   :  { %v1010_v17 = vmul.f32 %v978_v31, %v626_v9  ;;  %vm1427_vm4 = vcmp.eq.s32.totalorder %v2737_v10, 1  ;;  %vm1459_vm5 = vcmp.eq.s32.totalorder %v2737_v10, 2  ;;  %v888_v23 = vmul.f32 2.4801588e-05, %v2754_v2 }
 0x16b   :  { %v1011_v59 = vmul.f32 %v979_v49, %v2735_v12  ;;  %v2778_v62 = vmul.f32 %v2764_v24, %v2764_v24  ;;  %v696_v35 = vadd.f32 0.008333334, %v664_v6  ;;  %v2780_v16 = vand.u32 3, %v1749_v57  ;;  %vm1491_vm9 = vmor %vm1427_vm4, %vm1459_vm5 }
 0x16c   :  { %v818_v40 = vadd.f32 1.0, %v786_v11  ;;  %v819_v48 = vadd.f32 1.0, %v787_v32  ;;  %v1042_v43 = vadd.f32 -0.5, %v1010_v17  ;;  %vm1330_vm6 = vcmp.ge.s32.totalorder %v2722_v29, 2 }
 0x16d   :  { %v920_v20 = vadd.f32 -0.0013888889, %v888_v23  ;;  %v1043_v4 = vadd.f32 -0.5, %v1011_v59  ;;  %vm1331_vm7 = vcmp.ge.s32.totalorder %v2737_v10, 2  ;;  %v665_v58 = vmul.f32 -0.0001984127, %v2778_v62 }
 0x16e   :  { %v728_v45 = vmul.f32 %v696_v35, %v2754_v2  ;;  %v889_v7 = vmul.f32 2.4801588e-05, %v2778_v62  ;;  %v1074_v60 = vmul.f32 %v1042_v43, %v626_v9  ;;  %v1208_v36 = vand.u32 1, %v2756_v8 }
 0x16f   :  { %v952_v63 = vmul.f32 %v920_v20, %v2754_v2  ;;  %v1075_v3 = vmul.f32 %v1043_v4, %v2735_v12  ;;  %v697_v37 = vadd.f32 0.008333334, %v665_v58  ;;  %v850_v5 = vmul.f32 %v818_v40, %v2710_v54 }
 0x170   :  { %v760_v33 = vadd.f32 -0.16666667, %v728_v45  ;;  %v921_v14 = vadd.f32 -0.0013888889, %v889_v7  ;;  %v851_v42 = vmul.f32 %v819_v48, %v2712_v61  ;;  %v1106_v39 = vadd.f32 1.0, %v1074_v60 }
 0x171   :  { %v984_v0 = vadd.f32 0.041666668, %v952_v63  ;;  %v1107_v44 = vadd.f32 1.0, %v1075_v3  ;;  %v729_v9 = vmul.f32 %v697_v37, %v2778_v62  ;;  %v1209_v54 = vand.u32 1, %v2780_v16 }
 0x172   :  { %v792_v57 = vmul.f32 %v760_v33, %v2754_v2  ;;  %v953_v46 = vmul.f32 %v921_v14, %v2778_v62  ;;  %v1266_v27 = vsel %vm2758_vm0, %v1106_v39, %v850_v5  ;;  %v1298_v12 = vsel %vm2758_vm0, %v850_v5, %v1106_v39 }
 0x173   :  { %v1016_v38 = vmul.f32 %v984_v0, %v2754_v2  ;;  %v1267_v61 = vsel %vm2768_vm2, %v1107_v44, %v851_v42  ;;  %v1299_v13 = vsel %vm2768_vm2, %v851_v42, %v1107_v44  ;;  %v1362_v31 = vsub.f32 0.0, %v1266_v27 }
 0x174   :  { %v1522_v49 = vsub.f32 0.0, %v1298_v12  ;;  %v1363_v6 = vsub.f32 0.0, %v1267_v61  ;;  %v1523_v47 = vsub.f32 0.0, %v1299_v13  ;;  %v761_v11 = vadd.f32 -0.16666667, %v729_v9 }
 0x175   :  { %v824_v32 = vadd.f32 1.0, %v792_v57  ;;  %v1394_v17 = vsel %vm1330_vm6, %v1362_v31, %v1266_v27  ;;  %v985_v23 = vadd.f32 0.041666668, %v953_v46  ;;  %v1048_v59 = vadd.f32 -0.5, %v1016_v38 }
 0x176   :  { %v1554_v26 = vsel %vm1490_vm8, %v1522_v49, %v1298_v12  ;;  %v1395_v35 = vsel %vm1331_vm7, %v1363_v6, %v1267_v61  ;;  %v1555_v40 = vsel %vm1491_vm9, %v1523_v47, %v1299_v13  ;;  %1586 = vst [vmem:[#allocation2 + $0xe0] sm:$0xff] %v1394_v17  ;;  %v793_v48 = vmul.f32 %v761_v11, %v2778_v62 }
 0x177   :  { %1618 = vst [vmem:[#allocation2 + $0xf0] sm:$0xff] %v1554_v26  ;;  %v407_v43 = vmul.f32 %v2050_v55, %v344_v1  ;;  %1587 = vst [vmem:[#allocation2 + $0xe8] sm:$0xff] %v1395_v35  ;;  %v1017_v29 = vmul.f32 %v985_v23, %v2778_v62  ;;  %v1080_v20 = vmul.f32 %v1048_v59, %v2754_v2  ;;  %vm2822_vm10 = vcmp.eq.s32.totalorder %v1208_v36, 1  ;;  %v356_v2 = vpop.permute.xlu0 %355 }
 0x178   :  { %1619 = vst [vmem:[#allocation2 + $0xf8] sm:$0xff] %v1555_v40  ;;  %v825_v58 = vadd.f32 1.0, %v793_v48  ;;  %v856_v10 = vmul.f32 %v824_v32, %v2746_v28  ;;  %vm2827_vm11 = vcmp.eq.s32.totalorder %v1209_v54, 1  ;;  %vm1336_vm12 = vcmp.ge.s32.totalorder %v2756_v8, 2 }
 0x179   :  { %v1049_v1 = vadd.f32 -0.5, %v1017_v29  ;;  %v1112_v7 = vadd.f32 1.0, %v1080_v20  ;;  %vm1432_vm13 = vcmp.eq.s32.totalorder %v2756_v8, 1  ;;  %v438_v60 = vadd.f32 %v406_v34, %v2021_v41 }
 0x17a   :  { %vm1433_vm14 = vcmp.eq.s32.totalorder %v2780_v16, 1  ;;  %vm1464_vm15 = vcmp.eq.s32.totalorder %v2756_v8, 2  ;;  %vm1465_vm0 = vcmp.eq.s32.totalorder %v2780_v16, 2  ;;  %v439_v28 = vadd.f32 %v407_v43, %v2024_v15 }
 0x17b   :  { %v1081_v63 = vmul.f32 %v1049_v1, %v2778_v62  ;;  %v1272_v36 = vsel %vm2822_vm10, %v1112_v7, %v856_v10  ;;  %v1304_v3 = vsel %vm2822_vm10, %v856_v10, %v1112_v7  ;;  %v470_v37 = vmul.f32 4.0, %v438_v60  ;;  %vm1496_vm3 = vmor %vm1432_vm13, %vm1464_vm15 }
 0x17c   :  { %v857_v41 = vmul.f32 %v825_v58, %v2764_v24  ;;  %v1368_v34 = vsub.f32 0.0, %v1272_v36  ;;  %v1528_v33 = vsub.f32 0.0, %v1304_v3  ;;  %v471_v14 = vmul.f32 4.0, %v439_v28  ;;  %vm1497_vm2 = vmor %vm1433_vm14, %vm1465_vm0 }
 0x17d   :  { %v1113_v5 = vadd.f32 1.0, %v1081_v63  ;;  %v1670_v15 = vround.rtne.f32 %v470_v37  ;;  %v412_v42 = vmul.f32 %v2048_v50, %v356_v2  ;;  %v413_v62 = vmul.f32 %v2050_v55, %v356_v2  ;;  %v352_v63 = vpop.permute.xlu1 %351 }
 0x17e   :  { %v1400_v39 = vsel %vm1336_vm12, %v1368_v34, %v1272_v36  ;;  %v1560_v0 = vsel %vm1496_vm3, %v1528_v33, %v1304_v3  ;;  %v1671_v44 = vround.rtne.f32 %v471_v14  ;;  %v1740_v9 = vcvt.f32.s32 %v470_v37 }
 0x17f   :  { %v1273_v24 = vsel %vm2827_vm11, %v1113_v5, %v857_v41  ;;  %v1305_v57 = vsel %vm2827_vm11, %v857_v41, %v1113_v5  ;;  %1592 = vst [vmem:[#allocation2 + $0x140] sm:$0xff] %v1400_v39  ;;  %1624 = vst [vmem:[#allocation2 + $0x150] sm:$0xff] %v1560_v0  ;;  %v534_v46 = vmul.f32 0.25, %v1670_v15  ;;  %vm1337_vm1 = vcmp.ge.s32.totalorder %v2780_v16, 2 }
 0x180   :  { %v1369_v27 = vsub.f32 0.0, %v1273_v24  ;;  %v1529_v12 = vsub.f32 0.0, %v1305_v57  ;;  %v535_v38 = vmul.f32 0.25, %v1671_v44  ;;  %v1743_v54 = vcvt.f32.s32 %v471_v14 }
 0x181   :  { %v566_v8 = vsub.f32 %v438_v60, %v534_v46  ;;  %v444_v61 = vadd.f32 %v412_v42, %v2053_v52  ;;  %v445_v13 = vadd.f32 %v413_v62, %v2056_v53  ;;  %v2861_v47 = vand.u32 3, %v1740_v9 }
 0x182   :  { %v1401_v31 = vsel %vm1337_vm1, %v1369_v27, %v1273_v24  ;;  %v1561_v49 = vsel %vm1497_vm2, %v1529_v12, %v1305_v57  ;;  %v567_v6 = vsub.f32 %v439_v28, %v535_v38  ;;  %v2873_v53 = vand.u32 3, %v1743_v54 }
 0x183   :  { %1593 = vst [vmem:[#allocation2 + $0x148] sm:$0xff] %v1401_v31  ;;  %1625 = vst [vmem:[#allocation2 + $0x158] sm:$0xff] %v1561_v49  ;;  %v2863_v11 = vmul.f32 6.2831855, %v566_v8  ;;  %v476_v17 = vmul.f32 4.0, %v444_v61  ;;  %v477_v26 = vmul.f32 4.0, %v445_v13  ;;  %v410_v62 = vmul.f32 %v2048_v50, %v352_v63 }
 0x184   :  { %v2865_v32 = vmul.f32 6.2831855, %v567_v6  ;;  %v1206_v23 = vand.u32 1, %v2861_v47  ;;  %v1207_v28 = vand.u32 1, %v2873_v53  ;;  %vm1430_vm5 = vcmp.eq.s32.totalorder %v2861_v47, 1 }
 0x185   :  { %v630_v16 = vmul.f32 %v2863_v11, %v2863_v11  ;;  %v1676_v40 = vround.rtne.f32 %v476_v17  ;;  %v1677_v48 = vround.rtne.f32 %v477_v26  ;;  %v1758_v20 = vcvt.f32.s32 %v476_v17 }
 0x186   :  { %v2871_v52 = vmul.f32 %v2865_v32, %v2865_v32  ;;  %v1761_v4 = vcvt.f32.s32 %v477_v26  ;;  %vm2888_vm4 = vcmp.eq.s32.totalorder %v1206_v23, 1  ;;  %vm1462_vm6 = vcmp.eq.s32.totalorder %v2861_v47, 2 }
 0x187   :  { %v662_v59 = vmul.f32 -0.0001984127, %v630_v16  ;;  %v886_v35 = vmul.f32 2.4801588e-05, %v630_v16  ;;  %v540_v45 = vmul.f32 0.25, %v1676_v40  ;;  %v541_v1 = vmul.f32 0.25, %v1677_v48  ;;  %vm1494_vm12 = vmor %vm1430_vm5, %vm1462_vm6 }
 0x188   :  { %v663_v43 = vmul.f32 -0.0001984127, %v2871_v52  ;;  %v887_v29 = vmul.f32 2.4801588e-05, %v2871_v52  ;;  %v2879_v2 = vand.u32 3, %v1758_v20  ;;  %v2883_v14 = vand.u32 3, %v1761_v4 }
 0x189   :  { %v694_v58 = vadd.f32 0.008333334, %v662_v59  ;;  %v918_v10 = vadd.f32 -0.0013888889, %v886_v35  ;;  %v572_v37 = vsub.f32 %v444_v61, %v540_v45  ;;  %v573_v41 = vsub.f32 %v445_v13, %v541_v1 }
 0x18a   :  { %v695_v7 = vadd.f32 0.008333334, %v663_v43  ;;  %v919_v60 = vadd.f32 -0.0013888889, %v887_v29  ;;  %v411_v24 = vmul.f32 %v2050_v55, %v352_v63  ;;  %vm2897_vm7 = vcmp.eq.s32.totalorder %v1207_v28, 1 }
 0x18b   :  { %v726_v36 = vmul.f32 %v694_v58, %v630_v16  ;;  %v950_v3 = vmul.f32 %v918_v10, %v630_v16  ;;  %v2885_v42 = vmul.f32 6.2831855, %v572_v37  ;;  %v2894_v9 = vmul.f32 6.2831855, %v573_v41 }
 0x18c   :  { %v727_v34 = vmul.f32 %v695_v7, %v2871_v52  ;;  %v951_v33 = vmul.f32 %v919_v60, %v2871_v52  ;;  %vm1431_vm8 = vcmp.eq.s32.totalorder %v2873_v53, 1  ;;  %vm1463_vm9 = vcmp.eq.s32.totalorder %v2873_v53, 2 }
 0x18d   :  { %v758_v5 = vadd.f32 -0.16666667, %v726_v36  ;;  %v982_v15 = vadd.f32 0.041666668, %v950_v3  ;;  %v2905_v12 = vmul.f32 %v2885_v42, %v2885_v42  ;;  %v1212_v38 = vand.u32 1, %v2879_v2  ;;  %vm1495_vm13 = vmor %vm1431_vm8, %vm1463_vm9 }
 0x18e   :  { %v759_v39 = vadd.f32 -0.16666667, %v727_v34  ;;  %v983_v0 = vadd.f32 0.041666668, %v951_v33  ;;  %v2912_v61 = vmul.f32 %v2894_v9, %v2894_v9  ;;  %v1213_v13 = vand.u32 1, %v2883_v14 }
 0x18f   :  { %v790_v57 = vmul.f32 %v758_v5, %v630_v16  ;;  %v1014_v46 = vmul.f32 %v982_v15, %v630_v16  ;;  %vm1334_vm10 = vcmp.ge.s32.totalorder %v2861_v47, 2  ;;  %v668_v6 = vmul.f32 -0.0001984127, %v2905_v12 }
 0x190   :  { %v791_v8 = vmul.f32 %v759_v39, %v2871_v52  ;;  %v1015_v54 = vmul.f32 %v983_v0, %v2871_v52  ;;  %v892_v17 = vmul.f32 2.4801588e-05, %v2905_v12  ;;  %vm1335_vm11 = vcmp.ge.s32.totalorder %v2873_v53, 2 }
 0x191   :  { %v822_v31 = vadd.f32 1.0, %v790_v57  ;;  %v1046_v49 = vadd.f32 -0.5, %v1014_v46  ;;  %v669_v59 = vmul.f32 -0.0001984127, %v2912_v61  ;;  %v893_v35 = vmul.f32 2.4801588e-05, %v2912_v61 }
 0x192   :  { %v823_v26 = vadd.f32 1.0, %v791_v8  ;;  %v1047_v23 = vadd.f32 -0.5, %v1015_v54  ;;  %v700_v48 = vadd.f32 0.008333334, %v668_v6  ;;  %v924_v43 = vadd.f32 -0.0013888889, %v892_v17 }
 0x193   :  { %v1078_v40 = vmul.f32 %v1046_v49, %v630_v16  ;;  %v2922_v29 = vadd.f32 %v410_v62, %v2039_v25  ;;  %v701_v4 = vadd.f32 0.008333334, %v669_v59  ;;  %v925_v58 = vadd.f32 -0.0013888889, %v893_v35  ;;  %v364_v62 = vpop.permute.xlu0 %363 }
 0x194   :  { %v1079_v20 = vmul.f32 %v1047_v23, %v2871_v52  ;;  %v2926_v10 = vadd.f32 %v411_v24, %v2042_v30  ;;  %v854_v45 = vmul.f32 %v822_v31, %v2863_v11  ;;  %v732_v7 = vmul.f32 %v700_v48, %v2905_v12 }
 0x195   :  { %v1110_v1 = vadd.f32 1.0, %v1078_v40  ;;  %v956_v60 = vmul.f32 %v924_v43, %v2905_v12  ;;  %v855_v16 = vmul.f32 %v823_v26, %v2865_v32  ;;  %v733_v25 = vmul.f32 %v701_v4, %v2912_v61 }
 0x196   :  { %v1111_v28 = vadd.f32 1.0, %v1079_v20  ;;  %v957_v63 = vmul.f32 %v925_v58, %v2912_v61  ;;  %v764_v36 = vadd.f32 -0.16666667, %v732_v7  ;;  %v416_v31 = vmul.f32 %v2048_v50, %v364_v62 }
 0x197   :  { %v1270_v52 = vsel %vm2888_vm4, %v1110_v1, %v854_v45  ;;  %v1302_v30 = vsel %vm2888_vm4, %v854_v45, %v1110_v1  ;;  %v988_v11 = vadd.f32 0.041666668, %v956_v60  ;;  %v765_v5 = vadd.f32 -0.16666667, %v733_v25 }
 0x198   :  { %v1271_v3 = vsel %vm2897_vm7, %v1111_v28, %v855_v16  ;;  %v1303_v37 = vsel %vm2897_vm7, %v855_v16, %v1111_v28  ;;  %v1366_v32 = vsub.f32 0.0, %v1270_v52  ;;  %v1526_v41 = vsub.f32 0.0, %v1302_v30 }
 0x199   :  { %v1367_v34 = vsub.f32 0.0, %v1271_v3  ;;  %v1527_v33 = vsub.f32 0.0, %v1303_v37  ;;  %v796_v15 = vmul.f32 %v764_v36, %v2905_v12  ;;  %v989_v44 = vadd.f32 0.041666668, %v957_v63 }
 0x19a   :  { %v1398_v39 = vsel %vm1334_vm10, %v1366_v32, %v1270_v52  ;;  %v1558_v0 = vsel %vm1494_vm12, %v1526_v41, %v1302_v30  ;;  %v1020_v24 = vmul.f32 %v988_v11, %v2905_v12  ;;  %v797_v27 = vmul.f32 %v765_v5, %v2912_v61 }
 0x19b   :  { %v1399_v57 = vsel %vm1335_vm11, %v1367_v34, %v1271_v3  ;;  %v1559_v46 = vsel %vm1495_vm13, %v1527_v33, %v1303_v37  ;;  %1590 = vst [vmem:[#allocation2 + $0x120] sm:$0xff] %v1398_v39  ;;  %1622 = vst [vmem:[#allocation2 + $0x130] sm:$0xff] %v1558_v0  ;;  %v828_v8 = vadd.f32 1.0, %v796_v15  ;;  %v1021_v47 = vmul.f32 %v989_v44, %v2912_v61 }
 0x19c   :  { %1591 = vst [vmem:[#allocation2 + $0x128] sm:$0xff] %v1399_v57  ;;  %1623 = vst [vmem:[#allocation2 + $0x138] sm:$0xff] %v1559_v46  ;;  %v1052_v54 = vadd.f32 -0.5, %v1020_v24  ;;  %v417_v49 = vmul.f32 %v2050_v55, %v364_v62  ;;  %v829_v6 = vadd.f32 1.0, %v797_v27  ;;  %vm2960_vm14 = vcmp.eq.s32.totalorder %v1212_v38, 1 }
 0x19d   :  { %vm2964_vm15 = vcmp.eq.s32.totalorder %v1213_v13, 1  ;;  %vm1340_vm0 = vcmp.ge.s32.totalorder %v2879_v2, 2  ;;  %v1053_v26 = vadd.f32 -0.5, %v1021_v47  ;;  %v474_v59 = vmul.f32 4.0, %v2922_v29 }
 0x19e   :  { %v1084_v23 = vmul.f32 %v1052_v54, %v2905_v12  ;;  %v475_v35 = vmul.f32 4.0, %v2926_v10  ;;  %v860_v40 = vmul.f32 %v828_v8, %v2885_v42  ;;  %vm1436_vm3 = vcmp.eq.s32.totalorder %v2879_v2, 1 }
 0x19f   :  { %vm1437_vm1 = vcmp.eq.s32.totalorder %v2883_v14, 1  ;;  %vm1468_vm2 = vcmp.eq.s32.totalorder %v2879_v2, 2  ;;  %v1085_v38 = vmul.f32 %v1053_v26, %v2912_v61  ;;  %v1674_v48 = vround.rtne.f32 %v474_v59 }
 0x1a0   :  { %v1116_v13 = vadd.f32 1.0, %v1084_v23  ;;  %v1675_v43 = vround.rtne.f32 %v475_v35  ;;  %v861_v20 = vmul.f32 %v829_v6, %v2894_v9  ;;  %vm1469_vm4 = vcmp.eq.s32.totalorder %v2883_v14, 2  ;;  %vm1500_vm5 = vmor %vm1436_vm3, %vm1468_vm2 }
 0x1a1   :  { %v448_v12 = vadd.f32 %v416_v31, %v2085_v18  ;;  %v449_v4 = vadd.f32 %v417_v49, %v2088_v19  ;;  %v1117_v42 = vadd.f32 1.0, %v1085_v38  ;;  %v538_v1 = vmul.f32 0.25, %v1674_v48  ;;  %vm1501_vm7 = vmor %vm1437_vm1, %vm1469_vm4  ;;  %v360_v49 = vpop.permute.xlu1 %359 }
 0x1a2   :  { %v1276_v58 = vsel %vm2960_vm14, %v1116_v13, %v860_v40  ;;  %v1308_v45 = vsel %vm2960_vm14, %v860_v40, %v1116_v13  ;;  %v539_v60 = vmul.f32 0.25, %v1675_v43  ;;  %v1752_v16 = vcvt.f32.s32 %v474_v59 }
 0x1a3   :  { %v1372_v61 = vsub.f32 0.0, %v1276_v58  ;;  %v1532_v7 = vsub.f32 0.0, %v1308_v45  ;;  %v1277_v9 = vsel %vm2964_vm15, %v1117_v42, %v861_v20  ;;  %v1309_v18 = vsel %vm2964_vm15, %v861_v20, %v1117_v42 }
 0x1a4   :  { %v570_v19 = vsub.f32 %v2922_v29, %v538_v1  ;;  %v1755_v28 = vcvt.f32.s32 %v475_v35  ;;  %v1373_v25 = vsub.f32 0.0, %v1277_v9  ;;  %v1533_v52 = vsub.f32 0.0, %v1309_v18 }
 0x1a5   :  { %v1404_v63 = vsel %vm1340_vm0, %v1372_v61, %v1276_v58  ;;  %v1564_v30 = vsel %vm1500_vm5, %v1532_v7, %v1308_v45  ;;  %vm1341_vm6 = vcmp.ge.s32.totalorder %v2883_v14, 2  ;;  %v571_v36 = vsub.f32 %v2926_v10, %v539_v60 }
 0x1a6   :  { %1596 = vst [vmem:[#allocation2 + $0x180] sm:$0xff] %v1404_v63  ;;  %1628 = vst [vmem:[#allocation2 + $0x190] sm:$0xff] %v1564_v30  ;;  %v3002_v11 = vmul.f32 6.2831855, %v570_v19  ;;  %v480_v29 = vmul.f32 4.0, %v448_v12  ;;  %v1405_v3 = vsel %vm1341_vm6, %v1373_v25, %v1277_v9  ;;  %v1565_v37 = vsel %vm1501_vm7, %v1533_v52, %v1309_v18 }
 0x1a7   :  { %v481_v2 = vmul.f32 4.0, %v449_v4  ;;  %1597 = vst [vmem:[#allocation2 + $0x188] sm:$0xff] %v1405_v3  ;;  %1629 = vst [vmem:[#allocation2 + $0x198] sm:$0xff] %v1565_v37  ;;  %v3004_v32 = vmul.f32 6.2831855, %v571_v36  ;;  %v3008_v34 = vand.u32 3, %v1752_v16  ;;  %v414_v43 = vmul.f32 %v2048_v50, %v360_v49 }
 0x1a8   :  { %v634_v41 = vmul.f32 %v3002_v11, %v3002_v11  ;;  %v3010_v14 = vand.u32 3, %v1755_v28  ;;  %v1680_v15 = vround.rtne.f32 %v480_v29  ;;  %v1770_v26 = vcvt.f32.s32 %v480_v29 }
 0x1a9   :  { %v635_v10 = vmul.f32 %v3004_v32, %v3004_v32  ;;  %v1681_v62 = vround.rtne.f32 %v481_v2  ;;  %v1210_v57 = vand.u32 1, %v3008_v34  ;;  %v1773_v40 = vcvt.f32.s32 %v481_v2 }
 0x1aa   :  { %v666_v33 = vmul.f32 -0.0001984127, %v634_v41  ;;  %v890_v5 = vmul.f32 2.4801588e-05, %v634_v41  ;;  %v544_v46 = vmul.f32 0.25, %v1680_v15  ;;  %v1211_v31 = vand.u32 1, %v3010_v14 }
 0x1ab   :  { %v667_v39 = vmul.f32 -0.0001984127, %v635_v10  ;;  %v891_v44 = vmul.f32 2.4801588e-05, %v635_v10  ;;  %v545_v27 = vmul.f32 0.25, %v1681_v62  ;;  %vm3021_vm8 = vcmp.eq.s32.totalorder %v1210_v57, 1 }
 0x1ac   :  { %v698_v0 = vadd.f32 0.008333334, %v666_v33  ;;  %v922_v24 = vadd.f32 -0.0013888889, %v890_v5  ;;  %v576_v17 = vsub.f32 %v448_v12, %v544_v46  ;;  %vm1434_vm9 = vcmp.eq.s32.totalorder %v3008_v34, 1 }
 0x1ad   :  { %v699_v8 = vadd.f32 0.008333334, %v667_v39  ;;  %v923_v54 = vadd.f32 -0.0013888889, %v891_v44  ;;  %v577_v53 = vsub.f32 %v449_v4, %v545_v27  ;;  %vm1466_vm10 = vcmp.eq.s32.totalorder %v3008_v34, 2 }
 0x1ae   :  { %v730_v47 = vmul.f32 %v698_v0, %v634_v41  ;;  %v954_v6 = vmul.f32 %v922_v24, %v634_v41  ;;  %v3016_v13 = vmul.f32 6.2831855, %v576_v17  ;;  %vm3027_vm11 = vcmp.eq.s32.totalorder %v1211_v31, 1  ;;  %vm1498_vm0 = vmor %vm1434_vm9, %vm1466_vm10 }
 0x1af   :  { %v731_v23 = vmul.f32 %v699_v8, %v635_v10  ;;  %v955_v35 = vmul.f32 %v923_v54, %v635_v10  ;;  %v3018_v48 = vmul.f32 6.2831855, %v577_v53  ;;  %vm1435_vm12 = vcmp.eq.s32.totalorder %v3010_v14, 1 }
 0x1b0   :  { %v762_v59 = vadd.f32 -0.16666667, %v730_v47  ;;  %v986_v38 = vadd.f32 0.041666668, %v954_v6  ;;  %vm1467_vm13 = vcmp.eq.s32.totalorder %v3010_v14, 2  ;;  %v3035_v1 = vmul.f32 %v3016_v13, %v3016_v13 }
 0x1b1   :  { %v763_v20 = vadd.f32 -0.16666667, %v731_v23  ;;  %v987_v58 = vadd.f32 0.041666668, %v955_v35  ;;  %v3039_v61 = vmul.f32 %v3018_v48, %v3018_v48  ;;  %v415_v7 = vmul.f32 %v2050_v55, %v360_v49  ;;  %vm1499_vm3 = vmor %vm1435_vm12, %vm1467_vm13 }
 0x1b2   :  { %v794_v42 = vmul.f32 %v762_v59, %v634_v41  ;;  %v1018_v12 = vmul.f32 %v986_v38, %v634_v41  ;;  %v3042_v9 = vand.u32 3, %v1770_v26  ;;  %v3044_v18 = vand.u32 3, %v1773_v40 }
 0x1b3   :  { %v795_v60 = vmul.f32 %v763_v20, %v635_v10  ;;  %v1019_v16 = vmul.f32 %v987_v58, %v635_v10  ;;  %vm1338_vm14 = vcmp.ge.s32.totalorder %v3008_v34, 2  ;;  %v672_v25 = vmul.f32 -0.0001984127, %v3035_v1  ;;  %v368_v20 = vpop.permute.xlu1 %367 }
 0x1b4   :  { %v826_v19 = vadd.f32 1.0, %v794_v42  ;;  %v1050_v28 = vadd.f32 -0.5, %v1018_v12  ;;  %v673_v63 = vmul.f32 -0.0001984127, %v3039_v61  ;;  %vm1339_vm15 = vcmp.ge.s32.totalorder %v3010_v14, 2 }
 0x1b5   :  { %v827_v52 = vadd.f32 1.0, %v795_v60  ;;  %v1051_v30 = vadd.f32 -0.5, %v1019_v16  ;;  %v896_v36 = vmul.f32 2.4801588e-05, %v3035_v1  ;;  %v3052_v29 = vadd.f32 %v414_v43, %v2059_v51 }
 0x1b6   :  { %v1082_v3 = vmul.f32 %v1050_v28, %v634_v41  ;;  %v704_v37 = vadd.f32 0.008333334, %v672_v25  ;;  %v705_v2 = vadd.f32 0.008333334, %v673_v63  ;;  %v897_v33 = vmul.f32 2.4801588e-05, %v3039_v61 }
 0x1b7   :  { %v1083_v5 = vmul.f32 %v1051_v30, %v635_v10  ;;  %v928_v15 = vadd.f32 -0.0013888889, %v896_v36  ;;  %v1216_v62 = vand.u32 1, %v3042_v9  ;;  %v1217_v39 = vand.u32 1, %v3044_v18 }
 0x1b8   :  { %v858_v0 = vmul.f32 %v826_v19, %v3002_v11  ;;  %v1114_v44 = vadd.f32 1.0, %v1082_v3  ;;  %v736_v24 = vmul.f32 %v704_v37, %v3035_v1  ;;  %v737_v57 = vmul.f32 %v705_v2, %v3039_v61 }
 0x1b9   :  { %v859_v51 = vmul.f32 %v827_v52, %v3004_v32  ;;  %v1115_v41 = vadd.f32 1.0, %v1083_v5  ;;  %v929_v46 = vadd.f32 -0.0013888889, %v897_v33  ;;  %v960_v27 = vmul.f32 %v928_v15, %v3035_v1 }
 0x1ba   :  { %v1274_v10 = vsel %vm3021_vm8, %v1114_v44, %v858_v0  ;;  %v1306_v8 = vsel %vm3021_vm8, %v858_v0, %v1114_v44  ;;  %v768_v47 = vadd.f32 -0.16666667, %v736_v24  ;;  %v769_v54 = vadd.f32 -0.16666667, %v737_v57 }
 0x1bb   :  { %v1275_v11 = vsel %vm3027_vm11, %v1115_v41, %v859_v51  ;;  %v1307_v31 = vsel %vm3027_vm11, %v859_v51, %v1115_v41  ;;  %v1370_v49 = vsub.f32 0.0, %v1274_v10  ;;  %v1530_v32 = vsub.f32 0.0, %v1306_v8 }
 0x1bc   :  { %v1371_v6 = vsub.f32 0.0, %v1275_v11  ;;  %v1531_v17 = vsub.f32 0.0, %v1307_v31  ;;  %v800_v53 = vmul.f32 %v768_v47, %v3035_v1  ;;  %v447_v26 = vadd.f32 %v415_v7, %v2062_v56 }
 0x1bd   :  { %v1402_v23 = vsel %vm1338_vm14, %v1370_v49, %v1274_v10  ;;  %v1562_v59 = vsel %vm1498_vm0, %v1530_v32, %v1306_v8  ;;  %v961_v35 = vmul.f32 %v929_v46, %v3039_v61  ;;  %v992_v40 = vadd.f32 0.041666668, %v960_v27 }
 0x1be   :  { %v1403_v38 = vsel %vm1339_vm15, %v1371_v6, %v1275_v11  ;;  %v1563_v43 = vsel %vm1499_vm3, %v1531_v17, %v1307_v31  ;;  %1594 = vst [vmem:[#allocation2 + $0x160] sm:$0xff] %v1402_v23  ;;  %1626 = vst [vmem:[#allocation2 + $0x170] sm:$0xff] %v1562_v59  ;;  %v801_v56 = vmul.f32 %v769_v54, %v3039_v61  ;;  %v478_v58 = vmul.f32 4.0, %v3052_v29 }
 0x1bf   :  { %1595 = vst [vmem:[#allocation2 + $0x168] sm:$0xff] %v1403_v38  ;;  %1627 = vst [vmem:[#allocation2 + $0x178] sm:$0xff] %v1563_v43  ;;  %v993_v34 = vadd.f32 0.041666668, %v961_v35  ;;  %v1024_v42 = vmul.f32 %v992_v40, %v3035_v1  ;;  %v832_v45 = vadd.f32 1.0, %v800_v53  ;;  %vm3088_vm1 = vcmp.eq.s32.totalorder %v1216_v62, 1 }
 0x1c0   :  { %vm3092_vm2 = vcmp.eq.s32.totalorder %v1217_v39, 1  ;;  %v479_v4 = vmul.f32 4.0, %v447_v26  ;;  %vm1344_vm4 = vcmp.ge.s32.totalorder %v3042_v9, 2  ;;  %v1678_v16 = vround.rtne.f32 %v478_v58 }
 0x1c1   :  { %v1025_v7 = vmul.f32 %v993_v34, %v3039_v61  ;;  %v1056_v60 = vadd.f32 -0.5, %v1024_v42  ;;  %v418_v19 = vmul.f32 %v2048_v50, %v368_v20  ;;  %v833_v28 = vadd.f32 1.0, %v801_v56 }
 0x1c2   :  { %vm1440_vm5 = vcmp.eq.s32.totalorder %v3042_v9, 1  ;;  %vm1441_vm6 = vcmp.eq.s32.totalorder %v3044_v18, 1  ;;  %v1679_v25 = vround.rtne.f32 %v479_v4  ;;  %vm1472_vm7 = vcmp.eq.s32.totalorder %v3042_v9, 2 }
 0x1c3   :  { %v1057_v63 = vadd.f32 -0.5, %v1025_v7  ;;  %v1088_v52 = vmul.f32 %v1056_v60, %v3035_v1  ;;  %v542_v30 = vmul.f32 0.25, %v1678_v16  ;;  %v864_v36 = vmul.f32 %v832_v45, %v3016_v13  ;;  %vm1504_vm9 = vmor %vm1440_vm5, %vm1472_vm7 }
 0x1c4   :  { %vm1473_vm8 = vcmp.eq.s32.totalorder %v3044_v18, 2  ;;  %v543_v3 = vmul.f32 0.25, %v1679_v25  ;;  %v419_v37 = vmul.f32 %v2050_v55, %v368_v20  ;;  %v450_v5 = vadd.f32 %v418_v19, %v2091_v21 }
 0x1c5   :  { %v1089_v50 = vmul.f32 %v1057_v63, %v3039_v61  ;;  %v1120_v2 = vadd.f32 1.0, %v1088_v52  ;;  %v574_v33 = vsub.f32 %v3052_v29, %v542_v30  ;;  %v865_v15 = vmul.f32 %v833_v28, %v3018_v48  ;;  %vm1505_vm11 = vmor %vm1441_vm6, %vm1473_vm8 }
 0x1c6   :  { %v575_v1 = vsub.f32 %v447_v26, %v543_v3  ;;  %v1764_v62 = vcvt.f32.s32 %v478_v58  ;;  %v1767_v39 = vcvt.f32.s32 %v479_v4  ;;  %v451_v21 = vadd.f32 %v419_v37, %v2094_v22 }
 0x1c7   :  { %v1121_v0 = vadd.f32 1.0, %v1089_v50  ;;  %v1280_v13 = vsel %vm3088_vm1, %v1120_v2, %v864_v36  ;;  %v1312_v44 = vsel %vm3088_vm1, %v864_v36, %v1120_v2  ;;  %v3114_v55 = vmul.f32 6.2831855, %v574_v33 }
 0x1c8   :  { %v1376_v61 = vsub.f32 0.0, %v1280_v13  ;;  %v1536_v24 = vsub.f32 0.0, %v1312_v44  ;;  %v3116_v57 = vmul.f32 6.2831855, %v575_v1  ;;  %v3129_v41 = vmul.f32 4.0, %v450_v5 }
 0x1c9   :  { %v1281_v48 = vsel %vm3092_vm2, %v1121_v0, %v865_v15  ;;  %v1313_v29 = vsel %vm3092_vm2, %v865_v15, %v1121_v0  ;;  %v638_v51 = vmul.f32 %v3114_v55, %v3114_v55  ;;  %vm1345_vm10 = vcmp.ge.s32.totalorder %v3044_v18, 2 }
 0x1ca   :  { %v1377_v46 = vsub.f32 0.0, %v1281_v48  ;;  %v1408_v22 = vsel %vm1344_vm4, %v1376_v61, %v1280_v13  ;;  %v1537_v27 = vsub.f32 0.0, %v1313_v29  ;;  %v1568_v10 = vsel %vm1504_vm9, %v1536_v24, %v1312_v44 }
 0x1cb   :  { %1600 = vst [vmem:[#allocation2 + $0x1c0] sm:$0xff] %v1408_v22  ;;  %1632 = vst [vmem:[#allocation2 + $0x1d0] sm:$0xff] %v1568_v10  ;;  %v639_v8 = vmul.f32 %v3116_v57, %v3116_v57  ;;  %v670_v47 = vmul.f32 -0.0001984127, %v638_v51  ;;  %v894_v54 = vmul.f32 2.4801588e-05, %v638_v51  ;;  %v1682_v18 = vround.rtne.f32 %v3129_v41 }
 0x1cc   :  { %v1409_v11 = vsel %vm1345_vm10, %v1377_v46, %v1281_v48  ;;  %v1569_v31 = vsel %vm1505_vm11, %v1537_v27, %v1313_v29  ;;  %v3140_v9 = vand.u32 3, %v1764_v62  ;;  %v3142_v49 = vand.u32 3, %v1767_v39 }
 0x1cd   :  { %1601 = vst [vmem:[#allocation2 + $0x1c8] sm:$0xff] %v1409_v11  ;;  %1633 = vst [vmem:[#allocation2 + $0x1d8] sm:$0xff] %v1569_v31  ;;  %v671_v32 = vmul.f32 -0.0001984127, %v639_v8  ;;  %v702_v6 = vadd.f32 0.008333334, %v670_v47  ;;  %v1776_v13 = vcvt.f32.s32 %v3129_v41 }
 0x1ce   :  { %v895_v17 = vmul.f32 2.4801588e-05, %v639_v8  ;;  %v926_v53 = vadd.f32 -0.0013888889, %v894_v54  ;;  %v3145_v26 = vmul.f32 4.0, %v451_v21  ;;  %v546_v40 = vmul.f32 0.25, %v1682_v18 }
 0x1cf   :  { %v703_v23 = vadd.f32 0.008333334, %v671_v32  ;;  %v734_v59 = vmul.f32 %v702_v6, %v638_v51  ;;  %v1214_v43 = vand.u32 1, %v3140_v9  ;;  %v1215_v56 = vand.u32 1, %v3142_v49 }
 0x1d0   :  { %v927_v35 = vadd.f32 -0.0013888889, %v895_v17  ;;  %v958_v38 = vmul.f32 %v926_v53, %v638_v51  ;;  %v1683_v20 = vround.rtne.f32 %v3145_v26  ;;  %v578_v45 = vsub.f32 %v450_v5, %v546_v40 }
 0x1d1   :  { %v735_v34 = vmul.f32 %v703_v23, %v639_v8  ;;  %v766_v42 = vadd.f32 -0.16666667, %v734_v59  ;;  %vm3152_vm12 = vcmp.eq.s32.totalorder %v1214_v43, 1  ;;  %vm3156_vm13 = vcmp.eq.s32.totalorder %v1215_v56, 1 }
 0x1d2   :  { %v959_v58 = vmul.f32 %v927_v35, %v639_v8  ;;  %v990_v12 = vadd.f32 0.041666668, %v958_v38  ;;  %v547_v14 = vmul.f32 0.25, %v1683_v20  ;;  %v3150_v16 = vmul.f32 6.2831855, %v578_v45 }
 0x1d3   :  { %v767_v4 = vadd.f32 -0.16666667, %v735_v34  ;;  %v798_v7 = vmul.f32 %v766_v42, %v638_v51  ;;  %vm1438_vm14 = vcmp.eq.s32.totalorder %v3140_v9, 1  ;;  %vm1342_vm15 = vcmp.ge.s32.totalorder %v3140_v9, 2 }
 0x1d4   :  { %v991_v60 = vadd.f32 0.041666668, %v959_v58  ;;  %v1022_v19 = vmul.f32 %v990_v12, %v638_v51  ;;  %v579_v63 = vsub.f32 %v451_v21, %v547_v14  ;;  %v3163_v36 = vmul.f32 %v3150_v16, %v3150_v16 }
 0x1d5   :  { %v799_v52 = vmul.f32 %v767_v4, %v639_v8  ;;  %v830_v3 = vadd.f32 1.0, %v798_v7  ;;  %vm1439_vm0 = vcmp.eq.s32.totalorder %v3142_v49, 1  ;;  %vm1343_vm3 = vcmp.ge.s32.totalorder %v3142_v49, 2 }
 0x1d6   :  { %v1023_v30 = vmul.f32 %v991_v60, %v639_v8  ;;  %v1054_v37 = vadd.f32 -0.5, %v1022_v19  ;;  %v3167_v50 = vmul.f32 6.2831855, %v579_v63  ;;  %vm1470_vm1 = vcmp.eq.s32.totalorder %v3140_v9, 2 }
 0x1d7   :  { %v831_v2 = vadd.f32 1.0, %v799_v52  ;;  %v674_v5 = vmul.f32 -0.0001984127, %v3163_v36  ;;  %vm1471_vm2 = vcmp.eq.s32.totalorder %v3142_v49, 2  ;;  %v898_v62 = vmul.f32 2.4801588e-05, %v3163_v36  ;;  %vm1502_vm4 = vmor %vm1438_vm14, %vm1470_vm1 }
 0x1d8   :  { %v1055_v33 = vadd.f32 -0.5, %v1023_v30  ;;  %v1086_v15 = vmul.f32 %v1054_v37, %v638_v51  ;;  %v643_v1 = vmul.f32 %v3167_v50, %v3167_v50  ;;  %v1779_v44 = vcvt.f32.s32 %v3145_v26  ;;  %vm1503_vm5 = vmor %vm1439_vm0, %vm1471_vm2 }
 0x1d9   :  { %v706_v0 = vadd.f32 0.008333334, %v674_v5  ;;  %v862_v61 = vmul.f32 %v830_v3, %v3114_v55  ;;  %v863_v29 = vmul.f32 %v831_v2, %v3116_v57  ;;  %v930_v22 = vadd.f32 -0.0013888889, %v898_v62 }
 0x1da   :  { %v1087_v39 = vmul.f32 %v1055_v33, %v639_v8  ;;  %v1118_v24 = vadd.f32 1.0, %v1086_v15  ;;  %v675_v21 = vmul.f32 -0.0001984127, %v643_v1  ;;  %v899_v48 = vmul.f32 2.4801588e-05, %v643_v1 }
 0x1db   :  { %v738_v46 = vmul.f32 %v706_v0, %v3163_v36  ;;  %v962_v53 = vmul.f32 %v930_v22, %v3163_v36  ;;  %v1186_v56 = vand.u32 3, %v1776_v13  ;;  %v1187_v20 = vand.u32 3, %v1779_v44 }
 0x1dc   :  { %v1119_v51 = vadd.f32 1.0, %v1087_v39  ;;  %v1278_v27 = vsel %vm3152_vm12, %v1118_v24, %v862_v61  ;;  %v1310_v10 = vsel %vm3152_vm12, %v862_v61, %v1118_v24  ;;  %v707_v41 = vadd.f32 0.008333334, %v675_v21 }
 0x1dd   :  { %v931_v8 = vadd.f32 -0.0013888889, %v899_v48  ;;  %v1374_v54 = vsub.f32 0.0, %v1278_v27  ;;  %v1534_v57 = vsub.f32 0.0, %v1310_v10  ;;  %v770_v6 = vadd.f32 -0.16666667, %v738_v46 }
 0x1de   :  { %v1279_v55 = vsel %vm3156_vm13, %v1119_v51, %v863_v29  ;;  %v1311_v47 = vsel %vm3156_vm13, %v863_v29, %v1119_v51  ;;  %v739_v32 = vmul.f32 %v707_v41, %v643_v1  ;;  %v994_v40 = vadd.f32 0.041666668, %v962_v53 }
 0x1df   :  { %v1375_v11 = vsub.f32 0.0, %v1279_v55  ;;  %v1535_v31 = vsub.f32 0.0, %v1311_v47  ;;  %v1406_v17 = vsel %vm1342_vm15, %v1374_v54, %v1278_v27  ;;  %v1566_v18 = vsel %vm1502_vm4, %v1534_v57, %v1310_v10 }
 0x1e0   :  { %v963_v26 = vmul.f32 %v931_v8, %v643_v1  ;;  %1598 = vst [vmem:[#allocation2 + $0x1a0] sm:$0xff] %v1406_v17  ;;  %1630 = vst [vmem:[#allocation2 + $0x1b0] sm:$0xff] %v1566_v18  ;;  %v771_v35 = vadd.f32 -0.16666667, %v739_v32  ;;  %v802_v9 = vmul.f32 %v770_v6, %v3163_v36  ;;  %v1026_v34 = vmul.f32 %v994_v40, %v3163_v36 }
 0x1e1   :  { %v1407_v23 = vsel %vm1343_vm3, %v1375_v11, %v1279_v55  ;;  %v1567_v59 = vsel %vm1503_vm5, %v1535_v31, %v1311_v47  ;;  %v1218_v14 = vand.u32 1, %v1186_v56  ;;  %v1219_v4 = vand.u32 1, %v1187_v20 }
 0x1e2   :  { %1599 = vst [vmem:[#allocation2 + $0x1a8] sm:$0xff] %v1407_v23  ;;  %1631 = vst [vmem:[#allocation2 + $0x1b8] sm:$0xff] %v1567_v59  ;;  %v995_v38 = vadd.f32 0.041666668, %v963_v26  ;;  %v803_v43 = vmul.f32 %v771_v35, %v643_v1  ;;  %v834_v58 = vadd.f32 1.0, %v802_v9  ;;  %v1058_v49 = vadd.f32 -0.5, %v1026_v34 }
 0x1e3   :  { %vm1442_vm6 = vcmp.eq.s32.totalorder %v1186_v56, 1  ;;  %vm1474_vm7 = vcmp.eq.s32.totalorder %v1186_v56, 2  ;;  %vm1250_vm8 = vcmp.eq.s32.totalorder %v1218_v14, 1  ;;  %vm1251_vm9 = vcmp.eq.s32.totalorder %v1219_v4, 1 }
 0x1e4   :  { %v1027_v42 = vmul.f32 %v995_v38, %v643_v1  ;;  %v835_v45 = vadd.f32 1.0, %v803_v43  ;;  %v1090_v7 = vmul.f32 %v1058_v49, %v3163_v36  ;;  %v866_v19 = vmul.f32 %v834_v58, %v3150_v16  ;;  %vm1506_vm12 = vmor %vm1442_vm6, %vm1474_vm7 }
 0x1e5   :  { %vm1443_vm10 = vcmp.eq.s32.totalorder %v1187_v20, 1  ;;  %vm1475_vm11 = vcmp.eq.s32.totalorder %v1187_v20, 2  ;;  %vm1346_vm13 = vcmp.ge.s32.totalorder %v1186_v56, 2  ;;  %vm1347_vm14 = vcmp.ge.s32.totalorder %v1187_v20, 2 }
 0x1e6   :  { %v1059_v12 = vadd.f32 -0.5, %v1027_v42  ;;  %v867_v28 = vmul.f32 %v835_v45, %v3167_v50  ;;  %v1122_v25 = vadd.f32 1.0, %v1090_v7  ;;  %vm1507_vm15 = vmor %vm1443_vm10, %vm1475_vm11 }
 0x1e8   :  { %v1091_v60 = vmul.f32 %v1059_v12, %v643_v1  ;;  %v1282_v52 = vsel %vm1250_vm8, %v1122_v25, %v866_v19  ;;  %v1314_v3 = vsel %vm1250_vm8, %v866_v19, %v1122_v25 }
 0x1e9   :  { %v1378_v36 = vsub.f32 0.0, %v1282_v52  ;;  %v1538_v16 = vsub.f32 0.0, %v1314_v3 }
 0x1ea   :  { %v1123_v63 = vadd.f32 1.0, %v1091_v60 }
 0x1eb   :  { %v1410_v50 = vsel %vm1346_vm13, %v1378_v36, %v1282_v52  ;;  %v1570_v15 = vsel %vm1506_vm12, %v1538_v16, %v1314_v3 }
 0x1ec   :  { %v1283_v30 = vsel %vm1251_vm9, %v1123_v63, %v867_v28  ;;  %v1315_v37 = vsel %vm1251_vm9, %v867_v28, %v1123_v63  ;;  %1602 = vst [vmem:[#allocation2 + $0x1e0] sm:$0xff] %v1410_v50  ;;  %1634 = vst [vmem:[#allocation2 + $0x1f0] sm:$0xff] %v1570_v15 }
 0x1ed   :  { %v1379_v2 = vsub.f32 0.0, %v1283_v30  ;;  %v1539_v33 = vsub.f32 0.0, %v1315_v37 }
 0x1ef   :  { %v1411_v5 = vsel %vm1347_vm14, %v1379_v2, %v1283_v30  ;;  %v1571_v1 = vsel %vm1507_vm15, %v1539_v33, %v1315_v37 }
 0x1f0   :  { %1603 = vst [vmem:[#allocation2 + $0x1e8] sm:$0xff] %v1411_v5  ;;  %1635 = vst [vmem:[#allocation2 + $0x1f8] sm:$0xff] %v1571_v1 }
 0x1f1   :  { %1803 = shalt.err (!%p1800_p4)
}
 0x1f2   :  { %s1804_s18 = scalar_lea.hbm %s3224_s2, 8192 }
 0x1f3   :  { %p1805_p5 = scmp.ne.s32.totalorder %s3224_s2, %s1804_s18  ;;  %p1808_p6 = scmp.lt.u32.totalorder %s1804_s18, %s3224_s2 }
 0x1f5   :  { %p1810_p7 = pnand %p1808_p6, %p1805_p5 }
 0x1f7   :  { %1813 = shalt.err (!%p1810_p7)
}
 0x1f8   :  { %s1820_s23 = smov 512   ;;  %s1821_s24 = smov 32  }
 0x1f9   :  { %1647 = dma.vmem_to_hbm [thread:$0]  %s1642_s14, 8192, %s3224_s2, [#allocation3], %s1820_s23, %s1820_s23, %s1821_s24  }
 0x1fa   :  { %1814 = dma.done.wait [#allocation3], 8192  }
 0x1fb   :  { %1815 = vsyncadd [#allocation3], 4294959104 }
 0x1fc   :  { %1651 = vsyncpa [#allocation3], 1 }

</bundles_post_ra>
